<compile_context>
chip_gen: v7x
topology: tpu7x:2x2x1
jax: 0.10.0
libtpu: 0.0.40
codegen_flags: <defaults>
</compile_context>

<pallas_src>
import math

import numpy as np
import jax
import jax.numpy as jnp
from jax import lax
from jax.experimental import pallas as pl
from jax.experimental.pallas import tpu as pltpu

# ---------------- synthetic "config" (small shapes) ----------------
VOCAB = 128
HIDDEN = 32
N_HEADS = 4
HEAD_DIM = HIDDEN // N_HEADS
INTERMEDIATE = 64
N_LAYERS = 2
MAX_POS = 16
TYPE_VOCAB = 2
NUM_LABELS = 5
CLS_PAD = 128          # lane-dense padded classifier width (sliced back to 5)
LN_EPS = 1e-12         # BERT layer-norm eps


# ---------------- in-kernel helpers ----------------
def _layernorm(x, g, b):
    mu = jnp.mean(x, axis=-1, keepdims=True)
    xc = x - mu
    var = jnp.mean(xc * xc, axis=-1, keepdims=True)
    return xc * lax.rsqrt(var + LN_EPS) * g + b


def _gelu(x):
    # TODO(synk): HF BERT default "gelu" is the exact erf GELU; using the tanh
    # approximation ("gelu_new") for guaranteed Mosaic lowering.
    c = math.sqrt(2.0 / math.pi)
    return 0.5 * x * (1.0 + jnp.tanh(c * (x + 0.044715 * x * x * x)))


# ---------------- fused whole-model kernel ----------------
def _bert_fused_kernel(mask_ref, emb_ref, emb_ln_ref,
                       wqkv_ref, bqkv_ref, wo_ref, vec32_ref,
                       wi_ref, bi_ref, wo2_ref,
                       clsw_ref, clsb_ref,
                       out_ref):
    """Single grid step: the whole encoder for all B*S rows, fully on-chip."""
    scale = 1.0 / math.sqrt(HEAD_DIM)
    batch_mask = mask_ref[...]                       # [M, M] block-diag additive mask

    # Embedding LayerNorm (gamma/beta packed into one [2,1,H] slab).
    eln = emb_ln_ref[...]
    h = _layernorm(emb_ref[...], eln[0], eln[1])     # [M, H] f32

    for layer in range(N_LAYERS):
        slab = vec32_ref[layer]                      # [6, 1, H] f32 packed vectors
        bo, ln1g, ln1b, bo2, ln2g, ln2b = (slab[0], slab[1], slab[2],
                                           slab[3], slab[4], slab[5])

        # ---- fused QKV projection: one [M,H] x [H,3H] bf16 matmul ----
        qkv = jnp.dot(h.astype(jnp.bfloat16), wqkv_ref[layer],
                      preferred_element_type=jnp.float32) + bqkv_ref[layer]

        # ---- multi-head self-attention over ALL rows at once ----
        # Block-diagonal mask keeps batches from attending to each other, so
        # each head needs only one score push and one PV push.
        ctx_parts = []
        for hh in range(N_HEADS):
            c0 = hh * HEAD_DIM
            q_h = qkv[:, c0:c0 + HEAD_DIM].astype(jnp.bfloat16)
            k_h = qkv[:, HIDDEN + c0:HIDDEN + c0 + HEAD_DIM].astype(jnp.bfloat16)
            v_h = qkv[:, 2 * HIDDEN + c0:2 * HIDDEN + c0 + HEAD_DIM].astype(jnp.bfloat16)

            s = lax.dot_general(q_h, k_h, (((1,), (1,)), ((), ())),
                                preferred_element_type=jnp.float32)
            s = s * scale + batch_mask               # mask out cross-batch scores
            m = jnp.max(s, axis=-1, keepdims=True)
            p = jnp.exp(s - m)
            p = p * pl.reciprocal(jnp.sum(p, axis=-1, keepdims=True),
                                  approx=True)
            ctx_parts.append(jnp.dot(p.astype(jnp.bfloat16), v_h,
                                     preferred_element_type=jnp.float32))

        # Assemble a lane-dense [M, H] ctx block and do ONE K=32 projection dot
        # (replaces the 4-way 8-lane split-K sum).
        ctx = jnp.concatenate(ctx_parts, axis=-1).astype(jnp.bfloat16)
        attn_out = jnp.dot(ctx, wo_ref[layer],
                           preferred_element_type=jnp.float32) + bo
        h1 = _layernorm(attn_out + h, ln1g, ln1b)

        # ---- feed-forward block ----
        ffn = jnp.dot(h1.astype(jnp.bfloat16), wi_ref[layer],
                      preferred_element_type=jnp.float32) + bi_ref[layer]
        ffn = _gelu(ffn)
        ffn_out = jnp.dot(ffn.astype(jnp.bfloat16), wo2_ref[layer],
                          preferred_element_type=jnp.float32) + bo2
        h = _layernorm(ffn_out + h1, ln2g, ln2b)

    # ---- token-classification head (lane-dense 128-wide padded output) ----
    logits = jnp.dot(h.astype(jnp.bfloat16), clsw_ref[...],
                     preferred_element_type=jnp.float32) + clsb_ref[...]
    out_ref[...] = logits.astype(out_ref.dtype)


# ---------------- parameter init (deterministic, synthetic) ----------------
def init_params(key):
    keys = iter(jax.random.split(key, 16))

    def nrm(shape, dtype=jnp.float32):
        return (0.02 * jax.random.normal(next(keys), shape, jnp.float32)).astype(dtype)

    def zeros(shape):
        return jnp.zeros(shape, jnp.float32)

    def ones(shape):
        return jnp.ones(shape, jnp.float32)

    cls_w = 0.02 * jax.random.normal(next(keys), (HIDDEN, NUM_LABELS), jnp.float32)
    cls_w_pad = jnp.zeros((HIDDEN, CLS_PAD), jnp.float32).at[:, :NUM_LABELS].set(cls_w)
    cls_b_pad = jnp.zeros((1, CLS_PAD), jnp.float32)

    # Pack the six tiny per-layer [1, HIDDEN] vectors into one slab:
    # index 0..5 = attn-out bias, LN1 gamma, LN1 beta, FFN-out bias, LN2 gamma, LN2 beta.
    vec32 = jnp.stack([zeros((N_LAYERS, 1, HIDDEN)),   # bo
                       ones((N_LAYERS, 1, HIDDEN)),    # ln1_g
                       zeros((N_LAYERS, 1, HIDDEN)),   # ln1_b
                       zeros((N_LAYERS, 1, HIDDEN)),   # bo2
                       ones((N_LAYERS, 1, HIDDEN)),    # ln2_g
                       zeros((N_LAYERS, 1, HIDDEN))],  # ln2_b
                      axis=1)                          # [N_LAYERS, 6, 1, HIDDEN]

    emb_ln = jnp.stack([ones((1, HIDDEN)), zeros((1, HIDDEN))], axis=0)  # [2,1,H]

    return {
        "word_emb": nrm((VOCAB, HIDDEN)),
        "pos_emb": nrm((MAX_POS, HIDDEN)),
        "type_emb": nrm((TYPE_VOCAB, HIDDEN)),
        "emb_ln": emb_ln,
        # Matmul weights in bf16 (MXU bf16 path); biases / LN params stay f32.
        "wqkv": nrm((N_LAYERS, HIDDEN, 3 * HIDDEN), jnp.bfloat16),
        "bqkv": zeros((N_LAYERS, 1, 3 * HIDDEN)),
        "wo": nrm((N_LAYERS, HIDDEN, HIDDEN), jnp.bfloat16),
        "vec32": vec32,
        "wi": nrm((N_LAYERS, HIDDEN, INTERMEDIATE), jnp.bfloat16),
        "bi": zeros((N_LAYERS, 1, INTERMEDIATE)),
        "wo2": nrm((N_LAYERS, INTERMEDIATE, HIDDEN), jnp.bfloat16),
        "cls_w_pad": cls_w_pad.astype(jnp.bfloat16),
        "cls_b_pad": cls_b_pad,
    }


# ---------------- forward (logits path of BertTokenCls.forward) -------------
def bert_token_cls_forward(params, input_ids):
    B, S = input_ids.shape
    M = B * S

    # Embedding gather + pos/type add stay in plain JAX (XLA fuses them with
    # the gather); the kernel starts at the embedding LayerNorm.
    # TODO(synk): token_type_ids hard-coded to 0 and no attention_mask / labels
    # loss branch (eval logits path with full attention only).
    emb = (params["word_emb"][input_ids]
           + params["pos_emb"][jnp.arange(S)][None, :, :]
           + params["type_emb"][0][None, None, :]).reshape(M, HIDDEN)

    # Block-diagonal additive mask so all B*S rows go through the attention
    # GEMMs together without cross-batch attention. Built at trace time
    # (static shapes) — a tiny constant input.
    mask_np = np.where(
        (np.arange(M)[:, None] // S) == (np.arange(M)[None, :] // S),
        0.0, -1e30).astype(np.float32)
    batch_mask = jnp.asarray(mask_np)

    weight_order = ["emb_ln", "wqkv", "bqkv", "wo", "vec32",
                    "wi", "bi", "wo2", "cls_w_pad", "cls_b_pad"]
    weights = [params[k] for k in weight_order]

    def full_spec(shape):
        nd = len(shape)
        return pl.BlockSpec(shape, lambda i, nd=nd: (0,) * nd)

    in_specs = ([full_spec(batch_mask.shape),                 # [M, M] mask
                 pl.BlockSpec((M, HIDDEN), lambda i: (0, 0))]  # all rows at once
                + [full_spec(w.shape) for w in weights])       # resident weights

    out_pad = pl.pallas_call(
        _bert_fused_kernel,
        out_shape=jax.ShapeDtypeStruct((M, CLS_PAD), jnp.float32),
        grid=(1,),                                            # single step: no per-batch overhead
        in_specs=in_specs,
        out_specs=pl.BlockSpec((M, CLS_PAD), lambda i: (0, 0)),
        compiler_params=pltpu.CompilerParams(
            dimension_semantics=("arbitrary",)),
    )(batch_mask, emb, *weights)

    # Slice the padded classifier back to NUM_LABELS (cheap JAX slice).
    return out_pad[:, :NUM_LABELS].reshape(B, S, NUM_LABELS)


if __name__ == "__main__":
    key = jax.random.PRNGKey(0)
    pkey, ikey = jax.random.split(key)
    params = init_params(pkey)

    B, S = 2, 8
    input_ids = jax.random.randint(ikey, (B, S), 0, VOCAB, dtype=jnp.int32)

    fwd = jax.jit(bert_token_cls_forward)
    logits = fwd(params, input_ids)
    jax.block_until_ready(logits)

    assert logits.shape == (B, S, NUM_LABELS)
    assert logits.dtype == jnp.float32
    assert bool(jnp.all(jnp.isfinite(logits)))
    print("KERNEL_OK")
</pallas_src>

<mosaic_0001>
module attributes {stable_mosaic.version = 11 : i64} {
  func.func @_bert_fused_kernel(%arg0: i32, %arg1: memref<16x16xf32, #tpu.memory_space<vmem>>, %arg2: memref<16x32xf32, #tpu.memory_space<vmem>>, %arg3: memref<2x1x32xf32, #tpu.memory_space<vmem>>, %arg4: memref<2x32x96xbf16, #tpu.memory_space<vmem>>, %arg5: memref<2x1x96xf32, #tpu.memory_space<vmem>>, %arg6: memref<2x32x32xbf16, #tpu.memory_space<vmem>>, %arg7: memref<2x6x1x32xf32, #tpu.memory_space<vmem>>, %arg8: memref<2x32x64xbf16, #tpu.memory_space<vmem>>, %arg9: memref<2x1x64xf32, #tpu.memory_space<vmem>>, %arg10: memref<2x64x32xbf16, #tpu.memory_space<vmem>>, %arg11: memref<32x128xbf16, #tpu.memory_space<vmem>>, %arg12: memref<1x128xf32, #tpu.memory_space<vmem>>, %arg13: memref<16x128xf32, #tpu.memory_space<vmem>>) attributes {dimension_semantics = [#tpu.dimension_semantics<arbitrary>], iteration_bounds = array<i64: 1>, scalar_prefetch = 0 : i64, scratch_operands = 0 : i64, tpu.core_type = #tpu.core_type<tc>, window_params = [{pipeline_mode = #tpu.pipeline_mode<synchronous>, transform_indices = @transform_0, window_bounds = array<i64: 16, 16>}, {pipeline_mode = #tpu.pipeline_mode<synchronous>, transform_indices = @transform_1, window_bounds = array<i64: 16, 32>}, {pipeline_mode = #tpu.pipeline_mode<synchronous>, transform_indices = @transform_2, window_bounds = array<i64: 2, 1, 32>}, {pipeline_mode = #tpu.pipeline_mode<synchronous>, transform_indices = @transform_3, window_bounds = array<i64: 2, 32, 96>}, {pipeline_mode = #tpu.pipeline_mode<synchronous>, transform_indices = @transform_4, window_bounds = array<i64: 2, 1, 96>}, {pipeline_mode = #tpu.pipeline_mode<synchronous>, transform_indices = @transform_5, window_bounds = array<i64: 2, 32, 32>}, {pipeline_mode = #tpu.pipeline_mode<synchronous>, transform_indices = @transform_6, window_bounds = array<i64: 2, 6, 1, 32>}, {pipeline_mode = #tpu.pipeline_mode<synchronous>, transform_indices = @transform_7, window_bounds = array<i64: 2, 32, 64>}, {pipeline_mode = #tpu.pipeline_mode<synchronous>, transform_indices = @transform_8, window_bounds = array<i64: 2, 1, 64>}, {pipeline_mode = #tpu.pipeline_mode<synchronous>, transform_indices = @transform_9, window_bounds = array<i64: 2, 64, 32>}, {pipeline_mode = #tpu.pipeline_mode<synchronous>, transform_indices = @transform_10, window_bounds = array<i64: 32, 128>}, {pipeline_mode = #tpu.pipeline_mode<synchronous>, transform_indices = @transform_11, window_bounds = array<i64: 1, 128>}, {pipeline_mode = #tpu.pipeline_mode<synchronous>, transform_indices = @transform_12, window_bounds = array<i64: 16, 128>}]} {
    %c0 = arith.constant 0 : index
    %c0_0 = arith.constant 0 : index
    %0 = vector.load %arg1[%c0, %c0_0] : memref<16x16xf32, #tpu.memory_space<vmem>>, vector<16x16xf32>
    %c0_1 = arith.constant 0 : index
    %c0_2 = arith.constant 0 : index
    %c0_3 = arith.constant 0 : index
    %1 = vector.load %arg3[%c0_1, %c0_2, %c0_3] : memref<2x1x32xf32, #tpu.memory_space<vmem>>, vector<2x1x32xf32>
    %c0_4 = arith.constant 0 : index
    %c0_5 = arith.constant 0 : index
    %2 = vector.load %arg2[%c0_4, %c0_5] : memref<16x32xf32, #tpu.memory_space<vmem>>, vector<16x32xf32>
    %3 = vector.extract_strided_slice %1 {offsets = [0, 0, 0], sizes = [1, 1, 32], strides = [1, 1, 1]} : vector<2x1x32xf32> to vector<1x1x32xf32>
    %4 = vector.shape_cast %3 : vector<1x1x32xf32> to vector<1x32xf32>
    %5 = vector.extract_strided_slice %1 {offsets = [1, 0, 0], sizes = [1, 1, 32], strides = [1, 1, 1]} : vector<2x1x32xf32> to vector<1x1x32xf32>
    %6 = vector.shape_cast %5 : vector<1x1x32xf32> to vector<1x32xf32>
    %cst = arith.constant dense<0.000000e+00> : vector<16xf32>
    %7 = vector.multi_reduction <add>, %2, %cst [1] : vector<16x32xf32> to vector<16xf32>
    %8 = vector.shape_cast %7 : vector<16xf32> to vector<16x1xf32>
    %cst_6 = arith.constant 3.200000e+01 : f32
    %9 = vector.broadcast %cst_6 : f32 to vector<16x1xf32>
    %10 = arith.divf %8, %9 : vector<16x1xf32>
    %11 = vector.broadcast %10 : vector<16x1xf32> to vector<16x32xf32>
    %12 = arith.subf %2, %11 : vector<16x32xf32>
    %13 = arith.mulf %12, %12 : vector<16x32xf32>
    %cst_7 = arith.constant dense<0.000000e+00> : vector<16xf32>
    %14 = vector.multi_reduction <add>, %13, %cst_7 [1] : vector<16x32xf32> to vector<16xf32>
    %15 = vector.shape_cast %14 : vector<16xf32> to vector<16x1xf32>
    %cst_8 = arith.constant 3.200000e+01 : f32
    %16 = vector.broadcast %cst_8 : f32 to vector<16x1xf32>
    %17 = arith.divf %15, %16 : vector<16x1xf32>
    %cst_9 = arith.constant 9.99999996E-13 : f32
    %18 = vector.broadcast %cst_9 : f32 to vector<16x1xf32>
    %19 = arith.addf %17, %18 : vector<16x1xf32>
    %20 = math.rsqrt %19 : vector<16x1xf32>
    %21 = vector.broadcast %20 : vector<16x1xf32> to vector<16x32xf32>
    %22 = arith.mulf %12, %21 : vector<16x32xf32>
    %23 = vector.broadcast %4 : vector<1x32xf32> to vector<16x32xf32>
    %24 = arith.mulf %22, %23 : vector<16x32xf32>
    %25 = vector.broadcast %6 : vector<1x32xf32> to vector<16x32xf32>
    %26 = arith.addf %24, %25 : vector<16x32xf32>
    %c0_10 = arith.constant 0 : index
    %c0_11 = arith.constant 0 : index
    %c0_12 = arith.constant 0 : index
    %c0_13 = arith.constant 0 : index
    %27 = vector.load %arg7[%c0_10, %c0_11, %c0_12, %c0_13] : memref<2x6x1x32xf32, #tpu.memory_space<vmem>>, vector<1x6x1x32xf32>
    %28 = vector.shape_cast %27 : vector<1x6x1x32xf32> to vector<6x1x32xf32>
    %29 = vector.extract_strided_slice %28 {offsets = [0, 0, 0], sizes = [1, 1, 32], strides = [1, 1, 1]} : vector<6x1x32xf32> to vector<1x1x32xf32>
    %30 = vector.shape_cast %29 : vector<1x1x32xf32> to vector<1x32xf32>
    %31 = vector.extract_strided_slice %28 {offsets = [1, 0, 0], sizes = [1, 1, 32], strides = [1, 1, 1]} : vector<6x1x32xf32> to vector<1x1x32xf32>
    %32 = vector.shape_cast %31 : vector<1x1x32xf32> to vector<1x32xf32>
    %33 = vector.extract_strided_slice %28 {offsets = [2, 0, 0], sizes = [1, 1, 32], strides = [1, 1, 1]} : vector<6x1x32xf32> to vector<1x1x32xf32>
    %34 = vector.shape_cast %33 : vector<1x1x32xf32> to vector<1x32xf32>
    %35 = vector.extract_strided_slice %28 {offsets = [3, 0, 0], sizes = [1, 1, 32], strides = [1, 1, 1]} : vector<6x1x32xf32> to vector<1x1x32xf32>
    %36 = vector.shape_cast %35 : vector<1x1x32xf32> to vector<1x32xf32>
    %37 = vector.extract_strided_slice %28 {offsets = [4, 0, 0], sizes = [1, 1, 32], strides = [1, 1, 1]} : vector<6x1x32xf32> to vector<1x1x32xf32>
    %38 = vector.shape_cast %37 : vector<1x1x32xf32> to vector<1x32xf32>
    %39 = vector.extract_strided_slice %28 {offsets = [5, 0, 0], sizes = [1, 1, 32], strides = [1, 1, 1]} : vector<6x1x32xf32> to vector<1x1x32xf32>
    %40 = vector.shape_cast %39 : vector<1x1x32xf32> to vector<1x32xf32>
    %41 = arith.truncf %26 : vector<16x32xf32> to vector<16x32xbf16>
    %c0_14 = arith.constant 0 : index
    %c0_15 = arith.constant 0 : index
    %c0_16 = arith.constant 0 : index
    %42 = vector.load %arg4[%c0_14, %c0_15, %c0_16] : memref<2x32x96xbf16, #tpu.memory_space<vmem>>, vector<1x32x96xbf16>
    %43 = vector.shape_cast %42 : vector<1x32x96xbf16> to vector<32x96xbf16>
    %cst_17 = arith.constant dense<0.000000e+00> : vector<16x96xf32>
    %44 = tpu.matmul %41, %43, %cst_17 {dimension_numbers = #tpu.dot_dimension_numbers<[1], [0], [0], [1], [0, 0, 1, 1], [], []>} : vector<16x32xbf16>, vector<32x96xbf16>, vector<16x96xf32> -> vector<16x96xf32>
    %c0_18 = arith.constant 0 : index
    %c0_19 = arith.constant 0 : index
    %c0_20 = arith.constant 0 : index
    %45 = vector.load %arg5[%c0_18, %c0_19, %c0_20] : memref<2x1x96xf32, #tpu.memory_space<vmem>>, vector<1x1x96xf32>
    %46 = vector.shape_cast %45 : vector<1x1x96xf32> to vector<1x96xf32>
    %47 = vector.broadcast %46 : vector<1x96xf32> to vector<16x96xf32>
    %48 = arith.addf %44, %47 : vector<16x96xf32>
    %49 = vector.extract_strided_slice %48 {offsets = [0, 0], sizes = [16, 8], strides = [1, 1]} : vector<16x96xf32> to vector<16x8xf32>
    %50 = arith.truncf %49 : vector<16x8xf32> to vector<16x8xbf16>
    %51 = vector.extract_strided_slice %48 {offsets = [0, 32], sizes = [16, 8], strides = [1, 1]} : vector<16x96xf32> to vector<16x8xf32>
    %52 = arith.truncf %51 : vector<16x8xf32> to vector<16x8xbf16>
    %53 = vector.extract_strided_slice %48 {offsets = [0, 64], sizes = [16, 8], strides = [1, 1]} : vector<16x96xf32> to vector<16x8xf32>
    %54 = arith.truncf %53 : vector<16x8xf32> to vector<16x8xbf16>
    %cst_21 = arith.constant dense<0.000000e+00> : vector<16x16xf32>
    %55 = tpu.matmul %50, %52, %cst_21 {dimension_numbers = #tpu.dot_dimension_numbers<[1], [1], [0], [0], [0, 0, 1, 0], [], []>} : vector<16x8xbf16>, vector<16x8xbf16>, vector<16x16xf32> -> vector<16x16xf32>
    %cst_22 = arith.constant 0.353553385 : f32
    %56 = vector.broadcast %cst_22 : f32 to vector<16x16xf32>
    %57 = arith.mulf %55, %56 : vector<16x16xf32>
    %58 = arith.addf %57, %0 : vector<16x16xf32>
    %cst_23 = arith.constant dense<0xFF800000> : vector<16xf32>
    %59 = vector.multi_reduction <maximumf>, %58, %cst_23 [1] : vector<16x16xf32> to vector<16xf32>
    %60 = vector.shape_cast %59 : vector<16xf32> to vector<16x1xf32>
    %61 = vector.broadcast %60 : vector<16x1xf32> to vector<16x16xf32>
    %62 = arith.subf %58, %61 : vector<16x16xf32>
    %63 = math.exp %62 : vector<16x16xf32>
    %cst_24 = arith.constant dense<0.000000e+00> : vector<16xf32>
    %64 = vector.multi_reduction <add>, %63, %cst_24 [1] : vector<16x16xf32> to vector<16xf32>
    %65 = vector.shape_cast %64 : vector<16xf32> to vector<16x1xf32>
    %66 = tpu.reciprocal %65 {approx = true} : vector<16x1xf32> -> vector<16x1xf32>
    %67 = vector.broadcast %66 : vector<16x1xf32> to vector<16x16xf32>
    %68 = arith.mulf %63, %67 : vector<16x16xf32>
    %69 = arith.truncf %68 : vector<16x16xf32> to vector<16x16xbf16>
    %cst_25 = arith.constant dense<0.000000e+00> : vector<16x8xf32>
    %70 = tpu.matmul %69, %54, %cst_25 {dimension_numbers = #tpu.dot_dimension_numbers<[1], [0], [0], [1], [0, 0, 1, 1], [], []>} : vector<16x16xbf16>, vector<16x8xbf16>, vector<16x8xf32> -> vector<16x8xf32>
    %71 = vector.extract_strided_slice %48 {offsets = [0, 8], sizes = [16, 8], strides = [1, 1]} : vector<16x96xf32> to vector<16x8xf32>
    %72 = arith.truncf %71 : vector<16x8xf32> to vector<16x8xbf16>
    %73 = vector.extract_strided_slice %48 {offsets = [0, 40], sizes = [16, 8], strides = [1, 1]} : vector<16x96xf32> to vector<16x8xf32>
    %74 = arith.truncf %73 : vector<16x8xf32> to vector<16x8xbf16>
    %75 = vector.extract_strided_slice %48 {offsets = [0, 72], sizes = [16, 8], strides = [1, 1]} : vector<16x96xf32> to vector<16x8xf32>
    %76 = arith.truncf %75 : vector<16x8xf32> to vector<16x8xbf16>
    %cst_26 = arith.constant dense<0.000000e+00> : vector<16x16xf32>
    %77 = tpu.matmul %72, %74, %cst_26 {dimension_numbers = #tpu.dot_dimension_numbers<[1], [1], [0], [0], [0, 0, 1, 0], [], []>} : vector<16x8xbf16>, vector<16x8xbf16>, vector<16x16xf32> -> vector<16x16xf32>
    %cst_27 = arith.constant 0.353553385 : f32
    %78 = vector.broadcast %cst_27 : f32 to vector<16x16xf32>
    %79 = arith.mulf %77, %78 : vector<16x16xf32>
    %80 = arith.addf %79, %0 : vector<16x16xf32>
    %cst_28 = arith.constant dense<0xFF800000> : vector<16xf32>
    %81 = vector.multi_reduction <maximumf>, %80, %cst_28 [1] : vector<16x16xf32> to vector<16xf32>
    %82 = vector.shape_cast %81 : vector<16xf32> to vector<16x1xf32>
    %83 = vector.broadcast %82 : vector<16x1xf32> to vector<16x16xf32>
    %84 = arith.subf %80, %83 : vector<16x16xf32>
    %85 = math.exp %84 : vector<16x16xf32>
    %cst_29 = arith.constant dense<0.000000e+00> : vector<16xf32>
    %86 = vector.multi_reduction <add>, %85, %cst_29 [1] : vector<16x16xf32> to vector<16xf32>
    %87 = vector.shape_cast %86 : vector<16xf32> to vector<16x1xf32>
    %88 = tpu.reciprocal %87 {approx = true} : vector<16x1xf32> -> vector<16x1xf32>
    %89 = vector.broadcast %88 : vector<16x1xf32> to vector<16x16xf32>
    %90 = arith.mulf %85, %89 : vector<16x16xf32>
    %91 = arith.truncf %90 : vector<16x16xf32> to vector<16x16xbf16>
    %cst_30 = arith.constant dense<0.000000e+00> : vector<16x8xf32>
    %92 = tpu.matmul %91, %76, %cst_30 {dimension_numbers = #tpu.dot_dimension_numbers<[1], [0], [0], [1], [0, 0, 1, 1], [], []>} : vector<16x16xbf16>, vector<16x8xbf16>, vector<16x8xf32> -> vector<16x8xf32>
    %93 = vector.extract_strided_slice %48 {offsets = [0, 16], sizes = [16, 8], strides = [1, 1]} : vector<16x96xf32> to vector<16x8xf32>
    %94 = arith.truncf %93 : vector<16x8xf32> to vector<16x8xbf16>
    %95 = vector.extract_strided_slice %48 {offsets = [0, 48], sizes = [16, 8], strides = [1, 1]} : vector<16x96xf32> to vector<16x8xf32>
    %96 = arith.truncf %95 : vector<16x8xf32> to vector<16x8xbf16>
    %97 = vector.extract_strided_slice %48 {offsets = [0, 80], sizes = [16, 8], strides = [1, 1]} : vector<16x96xf32> to vector<16x8xf32>
    %98 = arith.truncf %97 : vector<16x8xf32> to vector<16x8xbf16>
    %cst_31 = arith.constant dense<0.000000e+00> : vector<16x16xf32>
    %99 = tpu.matmul %94, %96, %cst_31 {dimension_numbers = #tpu.dot_dimension_numbers<[1], [1], [0], [0], [0, 0, 1, 0], [], []>} : vector<16x8xbf16>, vector<16x8xbf16>, vector<16x16xf32> -> vector<16x16xf32>
    %cst_32 = arith.constant 0.353553385 : f32
    %100 = vector.broadcast %cst_32 : f32 to vector<16x16xf32>
    %101 = arith.mulf %99, %100 : vector<16x16xf32>
    %102 = arith.addf %101, %0 : vector<16x16xf32>
    %cst_33 = arith.constant dense<0xFF800000> : vector<16xf32>
    %103 = vector.multi_reduction <maximumf>, %102, %cst_33 [1] : vector<16x16xf32> to vector<16xf32>
    %104 = vector.shape_cast %103 : vector<16xf32> to vector<16x1xf32>
    %105 = vector.broadcast %104 : vector<16x1xf32> to vector<16x16xf32>
    %106 = arith.subf %102, %105 : vector<16x16xf32>
    %107 = math.exp %106 : vector<16x16xf32>
    %cst_34 = arith.constant dense<0.000000e+00> : vector<16xf32>
    %108 = vector.multi_reduction <add>, %107, %cst_34 [1] : vector<16x16xf32> to vector<16xf32>
    %109 = vector.shape_cast %108 : vector<16xf32> to vector<16x1xf32>
    %110 = tpu.reciprocal %109 {approx = true} : vector<16x1xf32> -> vector<16x1xf32>
    %111 = vector.broadcast %110 : vector<16x1xf32> to vector<16x16xf32>
    %112 = arith.mulf %107, %111 : vector<16x16xf32>
    %113 = arith.truncf %112 : vector<16x16xf32> to vector<16x16xbf16>
    %cst_35 = arith.constant dense<0.000000e+00> : vector<16x8xf32>
    %114 = tpu.matmul %113, %98, %cst_35 {dimension_numbers = #tpu.dot_dimension_numbers<[1], [0], [0], [1], [0, 0, 1, 1], [], []>} : vector<16x16xbf16>, vector<16x8xbf16>, vector<16x8xf32> -> vector<16x8xf32>
    %115 = vector.extract_strided_slice %48 {offsets = [0, 24], sizes = [16, 8], strides = [1, 1]} : vector<16x96xf32> to vector<16x8xf32>
    %116 = arith.truncf %115 : vector<16x8xf32> to vector<16x8xbf16>
    %117 = vector.extract_strided_slice %48 {offsets = [0, 56], sizes = [16, 8], strides = [1, 1]} : vector<16x96xf32> to vector<16x8xf32>
    %118 = arith.truncf %117 : vector<16x8xf32> to vector<16x8xbf16>
    %119 = vector.extract_strided_slice %48 {offsets = [0, 88], sizes = [16, 8], strides = [1, 1]} : vector<16x96xf32> to vector<16x8xf32>
    %120 = arith.truncf %119 : vector<16x8xf32> to vector<16x8xbf16>
    %cst_36 = arith.constant dense<0.000000e+00> : vector<16x16xf32>
    %121 = tpu.matmul %116, %118, %cst_36 {dimension_numbers = #tpu.dot_dimension_numbers<[1], [1], [0], [0], [0, 0, 1, 0], [], []>} : vector<16x8xbf16>, vector<16x8xbf16>, vector<16x16xf32> -> vector<16x16xf32>
    %cst_37 = arith.constant 0.353553385 : f32
    %122 = vector.broadcast %cst_37 : f32 to vector<16x16xf32>
    %123 = arith.mulf %121, %122 : vector<16x16xf32>
    %124 = arith.addf %123, %0 : vector<16x16xf32>
    %cst_38 = arith.constant dense<0xFF800000> : vector<16xf32>
    %125 = vector.multi_reduction <maximumf>, %124, %cst_38 [1] : vector<16x16xf32> to vector<16xf32>
    %126 = vector.shape_cast %125 : vector<16xf32> to vector<16x1xf32>
    %127 = vector.broadcast %126 : vector<16x1xf32> to vector<16x16xf32>
    %128 = arith.subf %124, %127 : vector<16x16xf32>
    %129 = math.exp %128 : vector<16x16xf32>
    %cst_39 = arith.constant dense<0.000000e+00> : vector<16xf32>
    %130 = vector.multi_reduction <add>, %129, %cst_39 [1] : vector<16x16xf32> to vector<16xf32>
    %131 = vector.shape_cast %130 : vector<16xf32> to vector<16x1xf32>
    %132 = tpu.reciprocal %131 {approx = true} : vector<16x1xf32> -> vector<16x1xf32>
    %133 = vector.broadcast %132 : vector<16x1xf32> to vector<16x16xf32>
    %134 = arith.mulf %129, %133 : vector<16x16xf32>
    %135 = arith.truncf %134 : vector<16x16xf32> to vector<16x16xbf16>
    %cst_40 = arith.constant dense<0.000000e+00> : vector<16x8xf32>
    %136 = tpu.matmul %135, %120, %cst_40 {dimension_numbers = #tpu.dot_dimension_numbers<[1], [0], [0], [1], [0, 0, 1, 1], [], []>} : vector<16x16xbf16>, vector<16x8xbf16>, vector<16x8xf32> -> vector<16x8xf32>
    %137 = tpu.concatenate %70, %92, %114, %136 in 1 : vector<16x8xf32>, vector<16x8xf32>, vector<16x8xf32>, vector<16x8xf32> -> vector<16x32xf32>
    %138 = arith.truncf %137 : vector<16x32xf32> to vector<16x32xbf16>
    %c0_41 = arith.constant 0 : index
    %c0_42 = arith.constant 0 : index
    %c0_43 = arith.constant 0 : index
    %139 = vector.load %arg6[%c0_41, %c0_42, %c0_43] : memref<2x32x32xbf16, #tpu.memory_space<vmem>>, vector<1x32x32xbf16>
    %140 = vector.shape_cast %139 : vector<1x32x32xbf16> to vector<32x32xbf16>
    %cst_44 = arith.constant dense<0.000000e+00> : vector<16x32xf32>
    %141 = tpu.matmul %138, %140, %cst_44 {dimension_numbers = #tpu.dot_dimension_numbers<[1], [0], [0], [1], [0, 0, 1, 1], [], []>} : vector<16x32xbf16>, vector<32x32xbf16>, vector<16x32xf32> -> vector<16x32xf32>
    %142 = vector.broadcast %30 : vector<1x32xf32> to vector<16x32xf32>
    %143 = arith.addf %141, %142 : vector<16x32xf32>
    %144 = arith.addf %143, %26 : vector<16x32xf32>
    %cst_45 = arith.constant dense<0.000000e+00> : vector<16xf32>
    %145 = vector.multi_reduction <add>, %144, %cst_45 [1] : vector<16x32xf32> to vector<16xf32>
    %146 = vector.shape_cast %145 : vector<16xf32> to vector<16x1xf32>
    %cst_46 = arith.constant 3.200000e+01 : f32
    %147 = vector.broadcast %cst_46 : f32 to vector<16x1xf32>
    %148 = arith.divf %146, %147 : vector<16x1xf32>
    %149 = vector.broadcast %148 : vector<16x1xf32> to vector<16x32xf32>
    %150 = arith.subf %144, %149 : vector<16x32xf32>
    %151 = arith.mulf %150, %150 : vector<16x32xf32>
    %cst_47 = arith.constant dense<0.000000e+00> : vector<16xf32>
    %152 = vector.multi_reduction <add>, %151, %cst_47 [1] : vector<16x32xf32> to vector<16xf32>
    %153 = vector.shape_cast %152 : vector<16xf32> to vector<16x1xf32>
    %cst_48 = arith.constant 3.200000e+01 : f32
    %154 = vector.broadcast %cst_48 : f32 to vector<16x1xf32>
    %155 = arith.divf %153, %154 : vector<16x1xf32>
    %cst_49 = arith.constant 9.99999996E-13 : f32
    %156 = vector.broadcast %cst_49 : f32 to vector<16x1xf32>
    %157 = arith.addf %155, %156 : vector<16x1xf32>
    %158 = math.rsqrt %157 : vector<16x1xf32>
    %159 = vector.broadcast %158 : vector<16x1xf32> to vector<16x32xf32>
    %160 = arith.mulf %150, %159 : vector<16x32xf32>
    %161 = vector.broadcast %32 : vector<1x32xf32> to vector<16x32xf32>
    %162 = arith.mulf %160, %161 : vector<16x32xf32>
    %163 = vector.broadcast %34 : vector<1x32xf32> to vector<16x32xf32>
    %164 = arith.addf %162, %163 : vector<16x32xf32>
    %165 = arith.truncf %164 : vector<16x32xf32> to vector<16x32xbf16>
    %c0_50 = arith.constant 0 : index
    %c0_51 = arith.constant 0 : index
    %c0_52 = arith.constant 0 : index
    %166 = vector.load %arg8[%c0_50, %c0_51, %c0_52] : memref<2x32x64xbf16, #tpu.memory_space<vmem>>, vector<1x32x64xbf16>
    %167 = vector.shape_cast %166 : vector<1x32x64xbf16> to vector<32x64xbf16>
    %cst_53 = arith.constant dense<0.000000e+00> : vector<16x64xf32>
    %168 = tpu.matmul %165, %167, %cst_53 {dimension_numbers = #tpu.dot_dimension_numbers<[1], [0], [0], [1], [0, 0, 1, 1], [], []>} : vector<16x32xbf16>, vector<32x64xbf16>, vector<16x64xf32> -> vector<16x64xf32>
    %c0_54 = arith.constant 0 : index
    %c0_55 = arith.constant 0 : index
    %c0_56 = arith.constant 0 : index
    %169 = vector.load %arg9[%c0_54, %c0_55, %c0_56] : memref<2x1x64xf32, #tpu.memory_space<vmem>>, vector<1x1x64xf32>
    %170 = vector.shape_cast %169 : vector<1x1x64xf32> to vector<1x64xf32>
    %171 = vector.broadcast %170 : vector<1x64xf32> to vector<16x64xf32>
    %172 = arith.addf %168, %171 : vector<16x64xf32>
    %cst_57 = arith.constant 5.000000e-01 : f32
    %173 = vector.broadcast %cst_57 : f32 to vector<16x64xf32>
    %174 = arith.mulf %173, %172 : vector<16x64xf32>
    %cst_58 = arith.constant 4.471500e-02 : f32
    %175 = vector.broadcast %cst_58 : f32 to vector<16x64xf32>
    %176 = arith.mulf %175, %172 : vector<16x64xf32>
    %177 = arith.mulf %176, %172 : vector<16x64xf32>
    %178 = arith.mulf %177, %172 : vector<16x64xf32>
    %179 = arith.addf %172, %178 : vector<16x64xf32>
    %cst_59 = arith.constant 0.797884583 : f32
    %180 = vector.broadcast %cst_59 : f32 to vector<16x64xf32>
    %181 = arith.mulf %180, %179 : vector<16x64xf32>
    %182 = math.tanh %181 : vector<16x64xf32>
    %cst_60 = arith.constant 1.000000e+00 : f32
    %183 = vector.broadcast %cst_60 : f32 to vector<16x64xf32>
    %184 = arith.addf %183, %182 : vector<16x64xf32>
    %185 = arith.mulf %174, %184 : vector<16x64xf32>
    %186 = arith.truncf %185 : vector<16x64xf32> to vector<16x64xbf16>
    %c0_61 = arith.constant 0 : index
    %c0_62 = arith.constant 0 : index
    %c0_63 = arith.constant 0 : index
    %187 = vector.load %arg10[%c0_61, %c0_62, %c0_63] : memref<2x64x32xbf16, #tpu.memory_space<vmem>>, vector<1x64x32xbf16>
    %188 = vector.shape_cast %187 : vector<1x64x32xbf16> to vector<64x32xbf16>
    %cst_64 = arith.constant dense<0.000000e+00> : vector<16x32xf32>
    %189 = tpu.matmul %186, %188, %cst_64 {dimension_numbers = #tpu.dot_dimension_numbers<[1], [0], [0], [1], [0, 0, 1, 1], [], []>} : vector<16x64xbf16>, vector<64x32xbf16>, vector<16x32xf32> -> vector<16x32xf32>
    %190 = vector.broadcast %36 : vector<1x32xf32> to vector<16x32xf32>
    %191 = arith.addf %189, %190 : vector<16x32xf32>
    %192 = arith.addf %191, %164 : vector<16x32xf32>
    %cst_65 = arith.constant dense<0.000000e+00> : vector<16xf32>
    %193 = vector.multi_reduction <add>, %192, %cst_65 [1] : vector<16x32xf32> to vector<16xf32>
    %194 = vector.shape_cast %193 : vector<16xf32> to vector<16x1xf32>
    %cst_66 = arith.constant 3.200000e+01 : f32
    %195 = vector.broadcast %cst_66 : f32 to vector<16x1xf32>
    %196 = arith.divf %194, %195 : vector<16x1xf32>
    %197 = vector.broadcast %196 : vector<16x1xf32> to vector<16x32xf32>
    %198 = arith.subf %192, %197 : vector<16x32xf32>
    %199 = arith.mulf %198, %198 : vector<16x32xf32>
    %cst_67 = arith.constant dense<0.000000e+00> : vector<16xf32>
    %200 = vector.multi_reduction <add>, %199, %cst_67 [1] : vector<16x32xf32> to vector<16xf32>
    %201 = vector.shape_cast %200 : vector<16xf32> to vector<16x1xf32>
    %cst_68 = arith.constant 3.200000e+01 : f32
    %202 = vector.broadcast %cst_68 : f32 to vector<16x1xf32>
    %203 = arith.divf %201, %202 : vector<16x1xf32>
    %cst_69 = arith.constant 9.99999996E-13 : f32
    %204 = vector.broadcast %cst_69 : f32 to vector<16x1xf32>
    %205 = arith.addf %203, %204 : vector<16x1xf32>
    %206 = math.rsqrt %205 : vector<16x1xf32>
    %207 = vector.broadcast %206 : vector<16x1xf32> to vector<16x32xf32>
    %208 = arith.mulf %198, %207 : vector<16x32xf32>
    %209 = vector.broadcast %38 : vector<1x32xf32> to vector<16x32xf32>
    %210 = arith.mulf %208, %209 : vector<16x32xf32>
    %211 = vector.broadcast %40 : vector<1x32xf32> to vector<16x32xf32>
    %212 = arith.addf %210, %211 : vector<16x32xf32>
    %c1 = arith.constant 1 : index
    %c0_70 = arith.constant 0 : index
    %c0_71 = arith.constant 0 : index
    %c0_72 = arith.constant 0 : index
    %213 = vector.load %arg7[%c1, %c0_70, %c0_71, %c0_72] : memref<2x6x1x32xf32, #tpu.memory_space<vmem>>, vector<1x6x1x32xf32>
    %214 = vector.shape_cast %213 : vector<1x6x1x32xf32> to vector<6x1x32xf32>
    %215 = vector.extract_strided_slice %214 {offsets = [0, 0, 0], sizes = [1, 1, 32], strides = [1, 1, 1]} : vector<6x1x32xf32> to vector<1x1x32xf32>
    %216 = vector.shape_cast %215 : vector<1x1x32xf32> to vector<1x32xf32>
    %217 = vector.extract_strided_slice %214 {offsets = [1, 0, 0], sizes = [1, 1, 32], strides = [1, 1, 1]} : vector<6x1x32xf32> to vector<1x1x32xf32>
    %218 = vector.shape_cast %217 : vector<1x1x32xf32> to vector<1x32xf32>
    %219 = vector.extract_strided_slice %214 {offsets = [2, 0, 0], sizes = [1, 1, 32], strides = [1, 1, 1]} : vector<6x1x32xf32> to vector<1x1x32xf32>
    %220 = vector.shape_cast %219 : vector<1x1x32xf32> to vector<1x32xf32>
    %221 = vector.extract_strided_slice %214 {offsets = [3, 0, 0], sizes = [1, 1, 32], strides = [1, 1, 1]} : vector<6x1x32xf32> to vector<1x1x32xf32>
    %222 = vector.shape_cast %221 : vector<1x1x32xf32> to vector<1x32xf32>
    %223 = vector.extract_strided_slice %214 {offsets = [4, 0, 0], sizes = [1, 1, 32], strides = [1, 1, 1]} : vector<6x1x32xf32> to vector<1x1x32xf32>
    %224 = vector.shape_cast %223 : vector<1x1x32xf32> to vector<1x32xf32>
    %225 = vector.extract_strided_slice %214 {offsets = [5, 0, 0], sizes = [1, 1, 32], strides = [1, 1, 1]} : vector<6x1x32xf32> to vector<1x1x32xf32>
    %226 = vector.shape_cast %225 : vector<1x1x32xf32> to vector<1x32xf32>
    %227 = arith.truncf %212 : vector<16x32xf32> to vector<16x32xbf16>
    %c1_73 = arith.constant 1 : index
    %c0_74 = arith.constant 0 : index
    %c0_75 = arith.constant 0 : index
    %228 = vector.load %arg4[%c1_73, %c0_74, %c0_75] : memref<2x32x96xbf16, #tpu.memory_space<vmem>>, vector<1x32x96xbf16>
    %229 = vector.shape_cast %228 : vector<1x32x96xbf16> to vector<32x96xbf16>
    %cst_76 = arith.constant dense<0.000000e+00> : vector<16x96xf32>
    %230 = tpu.matmul %227, %229, %cst_76 {dimension_numbers = #tpu.dot_dimension_numbers<[1], [0], [0], [1], [0, 0, 1, 1], [], []>} : vector<16x32xbf16>, vector<32x96xbf16>, vector<16x96xf32> -> vector<16x96xf32>
    %c1_77 = arith.constant 1 : index
    %c0_78 = arith.constant 0 : index
    %c0_79 = arith.constant 0 : index
    %231 = vector.load %arg5[%c1_77, %c0_78, %c0_79] : memref<2x1x96xf32, #tpu.memory_space<vmem>>, vector<1x1x96xf32>
    %232 = vector.shape_cast %231 : vector<1x1x96xf32> to vector<1x96xf32>
    %233 = vector.broadcast %232 : vector<1x96xf32> to vector<16x96xf32>
    %234 = arith.addf %230, %233 : vector<16x96xf32>
    %235 = vector.extract_strided_slice %234 {offsets = [0, 0], sizes = [16, 8], strides = [1, 1]} : vector<16x96xf32> to vector<16x8xf32>
    %236 = arith.truncf %235 : vector<16x8xf32> to vector<16x8xbf16>
    %237 = vector.extract_strided_slice %234 {offsets = [0, 32], sizes = [16, 8], strides = [1, 1]} : vector<16x96xf32> to vector<16x8xf32>
    %238 = arith.truncf %237 : vector<16x8xf32> to vector<16x8xbf16>
    %239 = vector.extract_strided_slice %234 {offsets = [0, 64], sizes = [16, 8], strides = [1, 1]} : vector<16x96xf32> to vector<16x8xf32>
    %240 = arith.truncf %239 : vector<16x8xf32> to vector<16x8xbf16>
    %cst_80 = arith.constant dense<0.000000e+00> : vector<16x16xf32>
    %241 = tpu.matmul %236, %238, %cst_80 {dimension_numbers = #tpu.dot_dimension_numbers<[1], [1], [0], [0], [0, 0, 1, 0], [], []>} : vector<16x8xbf16>, vector<16x8xbf16>, vector<16x16xf32> -> vector<16x16xf32>
    %cst_81 = arith.constant 0.353553385 : f32
    %242 = vector.broadcast %cst_81 : f32 to vector<16x16xf32>
    %243 = arith.mulf %241, %242 : vector<16x16xf32>
    %244 = arith.addf %243, %0 : vector<16x16xf32>
    %cst_82 = arith.constant dense<0xFF800000> : vector<16xf32>
    %245 = vector.multi_reduction <maximumf>, %244, %cst_82 [1] : vector<16x16xf32> to vector<16xf32>
    %246 = vector.shape_cast %245 : vector<16xf32> to vector<16x1xf32>
    %247 = vector.broadcast %246 : vector<16x1xf32> to vector<16x16xf32>
    %248 = arith.subf %244, %247 : vector<16x16xf32>
    %249 = math.exp %248 : vector<16x16xf32>
    %cst_83 = arith.constant dense<0.000000e+00> : vector<16xf32>
    %250 = vector.multi_reduction <add>, %249, %cst_83 [1] : vector<16x16xf32> to vector<16xf32>
    %251 = vector.shape_cast %250 : vector<16xf32> to vector<16x1xf32>
    %252 = tpu.reciprocal %251 {approx = true} : vector<16x1xf32> -> vector<16x1xf32>
    %253 = vector.broadcast %252 : vector<16x1xf32> to vector<16x16xf32>
    %254 = arith.mulf %249, %253 : vector<16x16xf32>
    %255 = arith.truncf %254 : vector<16x16xf32> to vector<16x16xbf16>
    %cst_84 = arith.constant dense<0.000000e+00> : vector<16x8xf32>
    %256 = tpu.matmul %255, %240, %cst_84 {dimension_numbers = #tpu.dot_dimension_numbers<[1], [0], [0], [1], [0, 0, 1, 1], [], []>} : vector<16x16xbf16>, vector<16x8xbf16>, vector<16x8xf32> -> vector<16x8xf32>
    %257 = vector.extract_strided_slice %234 {offsets = [0, 8], sizes = [16, 8], strides = [1, 1]} : vector<16x96xf32> to vector<16x8xf32>
    %258 = arith.truncf %257 : vector<16x8xf32> to vector<16x8xbf16>
    %259 = vector.extract_strided_slice %234 {offsets = [0, 40], sizes = [16, 8], strides = [1, 1]} : vector<16x96xf32> to vector<16x8xf32>
    %260 = arith.truncf %259 : vector<16x8xf32> to vector<16x8xbf16>
    %261 = vector.extract_strided_slice %234 {offsets = [0, 72], sizes = [16, 8], strides = [1, 1]} : vector<16x96xf32> to vector<16x8xf32>
    %262 = arith.truncf %261 : vector<16x8xf32> to vector<16x8xbf16>
    %cst_85 = arith.constant dense<0.000000e+00> : vector<16x16xf32>
    %263 = tpu.matmul %258, %260, %cst_85 {dimension_numbers = #tpu.dot_dimension_numbers<[1], [1], [0], [0], [0, 0, 1, 0], [], []>} : vector<16x8xbf16>, vector<16x8xbf16>, vector<16x16xf32> -> vector<16x16xf32>
    %cst_86 = arith.constant 0.353553385 : f32
    %264 = vector.broadcast %cst_86 : f32 to vector<16x16xf32>
    %265 = arith.mulf %263, %264 : vector<16x16xf32>
    %266 = arith.addf %265, %0 : vector<16x16xf32>
    %cst_87 = arith.constant dense<0xFF800000> : vector<16xf32>
    %267 = vector.multi_reduction <maximumf>, %266, %cst_87 [1] : vector<16x16xf32> to vector<16xf32>
    %268 = vector.shape_cast %267 : vector<16xf32> to vector<16x1xf32>
    %269 = vector.broadcast %268 : vector<16x1xf32> to vector<16x16xf32>
    %270 = arith.subf %266, %269 : vector<16x16xf32>
    %271 = math.exp %270 : vector<16x16xf32>
    %cst_88 = arith.constant dense<0.000000e+00> : vector<16xf32>
    %272 = vector.multi_reduction <add>, %271, %cst_88 [1] : vector<16x16xf32> to vector<16xf32>
    %273 = vector.shape_cast %272 : vector<16xf32> to vector<16x1xf32>
    %274 = tpu.reciprocal %273 {approx = true} : vector<16x1xf32> -> vector<16x1xf32>
    %275 = vector.broadcast %274 : vector<16x1xf32> to vector<16x16xf32>
    %276 = arith.mulf %271, %275 : vector<16x16xf32>
    %277 = arith.truncf %276 : vector<16x16xf32> to vector<16x16xbf16>
    %cst_89 = arith.constant dense<0.000000e+00> : vector<16x8xf32>
    %278 = tpu.matmul %277, %262, %cst_89 {dimension_numbers = #tpu.dot_dimension_numbers<[1], [0], [0], [1], [0, 0, 1, 1], [], []>} : vector<16x16xbf16>, vector<16x8xbf16>, vector<16x8xf32> -> vector<16x8xf32>
    %279 = vector.extract_strided_slice %234 {offsets = [0, 16], sizes = [16, 8], strides = [1, 1]} : vector<16x96xf32> to vector<16x8xf32>
    %280 = arith.truncf %279 : vector<16x8xf32> to vector<16x8xbf16>
    %281 = vector.extract_strided_slice %234 {offsets = [0, 48], sizes = [16, 8], strides = [1, 1]} : vector<16x96xf32> to vector<16x8xf32>
    %282 = arith.truncf %281 : vector<16x8xf32> to vector<16x8xbf16>
    %283 = vector.extract_strided_slice %234 {offsets = [0, 80], sizes = [16, 8], strides = [1, 1]} : vector<16x96xf32> to vector<16x8xf32>
    %284 = arith.truncf %283 : vector<16x8xf32> to vector<16x8xbf16>
    %cst_90 = arith.constant dense<0.000000e+00> : vector<16x16xf32>
    %285 = tpu.matmul %280, %282, %cst_90 {dimension_numbers = #tpu.dot_dimension_numbers<[1], [1], [0], [0], [0, 0, 1, 0], [], []>} : vector<16x8xbf16>, vector<16x8xbf16>, vector<16x16xf32> -> vector<16x16xf32>
    %cst_91 = arith.constant 0.353553385 : f32
    %286 = vector.broadcast %cst_91 : f32 to vector<16x16xf32>
    %287 = arith.mulf %285, %286 : vector<16x16xf32>
    %288 = arith.addf %287, %0 : vector<16x16xf32>
    %cst_92 = arith.constant dense<0xFF800000> : vector<16xf32>
    %289 = vector.multi_reduction <maximumf>, %288, %cst_92 [1] : vector<16x16xf32> to vector<16xf32>
    %290 = vector.shape_cast %289 : vector<16xf32> to vector<16x1xf32>
    %291 = vector.broadcast %290 : vector<16x1xf32> to vector<16x16xf32>
    %292 = arith.subf %288, %291 : vector<16x16xf32>
    %293 = math.exp %292 : vector<16x16xf32>
    %cst_93 = arith.constant dense<0.000000e+00> : vector<16xf32>
    %294 = vector.multi_reduction <add>, %293, %cst_93 [1] : vector<16x16xf32> to vector<16xf32>
    %295 = vector.shape_cast %294 : vector<16xf32> to vector<16x1xf32>
    %296 = tpu.reciprocal %295 {approx = true} : vector<16x1xf32> -> vector<16x1xf32>
    %297 = vector.broadcast %296 : vector<16x1xf32> to vector<16x16xf32>
    %298 = arith.mulf %293, %297 : vector<16x16xf32>
    %299 = arith.truncf %298 : vector<16x16xf32> to vector<16x16xbf16>
    %cst_94 = arith.constant dense<0.000000e+00> : vector<16x8xf32>
    %300 = tpu.matmul %299, %284, %cst_94 {dimension_numbers = #tpu.dot_dimension_numbers<[1], [0], [0], [1], [0, 0, 1, 1], [], []>} : vector<16x16xbf16>, vector<16x8xbf16>, vector<16x8xf32> -> vector<16x8xf32>
    %301 = vector.extract_strided_slice %234 {offsets = [0, 24], sizes = [16, 8], strides = [1, 1]} : vector<16x96xf32> to vector<16x8xf32>
    %302 = arith.truncf %301 : vector<16x8xf32> to vector<16x8xbf16>
    %303 = vector.extract_strided_slice %234 {offsets = [0, 56], sizes = [16, 8], strides = [1, 1]} : vector<16x96xf32> to vector<16x8xf32>
    %304 = arith.truncf %303 : vector<16x8xf32> to vector<16x8xbf16>
    %305 = vector.extract_strided_slice %234 {offsets = [0, 88], sizes = [16, 8], strides = [1, 1]} : vector<16x96xf32> to vector<16x8xf32>
    %306 = arith.truncf %305 : vector<16x8xf32> to vector<16x8xbf16>
    %cst_95 = arith.constant dense<0.000000e+00> : vector<16x16xf32>
    %307 = tpu.matmul %302, %304, %cst_95 {dimension_numbers = #tpu.dot_dimension_numbers<[1], [1], [0], [0], [0, 0, 1, 0], [], []>} : vector<16x8xbf16>, vector<16x8xbf16>, vector<16x16xf32> -> vector<16x16xf32>
    %cst_96 = arith.constant 0.353553385 : f32
    %308 = vector.broadcast %cst_96 : f32 to vector<16x16xf32>
    %309 = arith.mulf %307, %308 : vector<16x16xf32>
    %310 = arith.addf %309, %0 : vector<16x16xf32>
    %cst_97 = arith.constant dense<0xFF800000> : vector<16xf32>
    %311 = vector.multi_reduction <maximumf>, %310, %cst_97 [1] : vector<16x16xf32> to vector<16xf32>
    %312 = vector.shape_cast %311 : vector<16xf32> to vector<16x1xf32>
    %313 = vector.broadcast %312 : vector<16x1xf32> to vector<16x16xf32>
    %314 = arith.subf %310, %313 : vector<16x16xf32>
    %315 = math.exp %314 : vector<16x16xf32>
    %cst_98 = arith.constant dense<0.000000e+00> : vector<16xf32>
    %316 = vector.multi_reduction <add>, %315, %cst_98 [1] : vector<16x16xf32> to vector<16xf32>
    %317 = vector.shape_cast %316 : vector<16xf32> to vector<16x1xf32>
    %318 = tpu.reciprocal %317 {approx = true} : vector<16x1xf32> -> vector<16x1xf32>
    %319 = vector.broadcast %318 : vector<16x1xf32> to vector<16x16xf32>
    %320 = arith.mulf %315, %319 : vector<16x16xf32>
    %321 = arith.truncf %320 : vector<16x16xf32> to vector<16x16xbf16>
    %cst_99 = arith.constant dense<0.000000e+00> : vector<16x8xf32>
    %322 = tpu.matmul %321, %306, %cst_99 {dimension_numbers = #tpu.dot_dimension_numbers<[1], [0], [0], [1], [0, 0, 1, 1], [], []>} : vector<16x16xbf16>, vector<16x8xbf16>, vector<16x8xf32> -> vector<16x8xf32>
    %323 = tpu.concatenate %256, %278, %300, %322 in 1 : vector<16x8xf32>, vector<16x8xf32>, vector<16x8xf32>, vector<16x8xf32> -> vector<16x32xf32>
    %324 = arith.truncf %323 : vector<16x32xf32> to vector<16x32xbf16>
    %c1_100 = arith.constant 1 : index
    %c0_101 = arith.constant 0 : index
    %c0_102 = arith.constant 0 : index
    %325 = vector.load %arg6[%c1_100, %c0_101, %c0_102] : memref<2x32x32xbf16, #tpu.memory_space<vmem>>, vector<1x32x32xbf16>
    %326 = vector.shape_cast %325 : vector<1x32x32xbf16> to vector<32x32xbf16>
    %cst_103 = arith.constant dense<0.000000e+00> : vector<16x32xf32>
    %327 = tpu.matmul %324, %326, %cst_103 {dimension_numbers = #tpu.dot_dimension_numbers<[1], [0], [0], [1], [0, 0, 1, 1], [], []>} : vector<16x32xbf16>, vector<32x32xbf16>, vector<16x32xf32> -> vector<16x32xf32>
    %328 = vector.broadcast %216 : vector<1x32xf32> to vector<16x32xf32>
    %329 = arith.addf %327, %328 : vector<16x32xf32>
    %330 = arith.addf %329, %212 : vector<16x32xf32>
    %cst_104 = arith.constant dense<0.000000e+00> : vector<16xf32>
    %331 = vector.multi_reduction <add>, %330, %cst_104 [1] : vector<16x32xf32> to vector<16xf32>
    %332 = vector.shape_cast %331 : vector<16xf32> to vector<16x1xf32>
    %cst_105 = arith.constant 3.200000e+01 : f32
    %333 = vector.broadcast %cst_105 : f32 to vector<16x1xf32>
    %334 = arith.divf %332, %333 : vector<16x1xf32>
    %335 = vector.broadcast %334 : vector<16x1xf32> to vector<16x32xf32>
    %336 = arith.subf %330, %335 : vector<16x32xf32>
    %337 = arith.mulf %336, %336 : vector<16x32xf32>
    %cst_106 = arith.constant dense<0.000000e+00> : vector<16xf32>
    %338 = vector.multi_reduction <add>, %337, %cst_106 [1] : vector<16x32xf32> to vector<16xf32>
    %339 = vector.shape_cast %338 : vector<16xf32> to vector<16x1xf32>
    %cst_107 = arith.constant 3.200000e+01 : f32
    %340 = vector.broadcast %cst_107 : f32 to vector<16x1xf32>
    %341 = arith.divf %339, %340 : vector<16x1xf32>
    %cst_108 = arith.constant 9.99999996E-13 : f32
    %342 = vector.broadcast %cst_108 : f32 to vector<16x1xf32>
    %343 = arith.addf %341, %342 : vector<16x1xf32>
    %344 = math.rsqrt %343 : vector<16x1xf32>
    %345 = vector.broadcast %344 : vector<16x1xf32> to vector<16x32xf32>
    %346 = arith.mulf %336, %345 : vector<16x32xf32>
    %347 = vector.broadcast %218 : vector<1x32xf32> to vector<16x32xf32>
    %348 = arith.mulf %346, %347 : vector<16x32xf32>
    %349 = vector.broadcast %220 : vector<1x32xf32> to vector<16x32xf32>
    %350 = arith.addf %348, %349 : vector<16x32xf32>
    %351 = arith.truncf %350 : vector<16x32xf32> to vector<16x32xbf16>
    %c1_109 = arith.constant 1 : index
    %c0_110 = arith.constant 0 : index
    %c0_111 = arith.constant 0 : index
    %352 = vector.load %arg8[%c1_109, %c0_110, %c0_111] : memref<2x32x64xbf16, #tpu.memory_space<vmem>>, vector<1x32x64xbf16>
    %353 = vector.shape_cast %352 : vector<1x32x64xbf16> to vector<32x64xbf16>
    %cst_112 = arith.constant dense<0.000000e+00> : vector<16x64xf32>
    %354 = tpu.matmul %351, %353, %cst_112 {dimension_numbers = #tpu.dot_dimension_numbers<[1], [0], [0], [1], [0, 0, 1, 1], [], []>} : vector<16x32xbf16>, vector<32x64xbf16>, vector<16x64xf32> -> vector<16x64xf32>
    %c1_113 = arith.constant 1 : index
    %c0_114 = arith.constant 0 : index
    %c0_115 = arith.constant 0 : index
    %355 = vector.load %arg9[%c1_113, %c0_114, %c0_115] : memref<2x1x64xf32, #tpu.memory_space<vmem>>, vector<1x1x64xf32>
    %356 = vector.shape_cast %355 : vector<1x1x64xf32> to vector<1x64xf32>
    %357 = vector.broadcast %356 : vector<1x64xf32> to vector<16x64xf32>
    %358 = arith.addf %354, %357 : vector<16x64xf32>
    %cst_116 = arith.constant 5.000000e-01 : f32
    %359 = vector.broadcast %cst_116 : f32 to vector<16x64xf32>
    %360 = arith.mulf %359, %358 : vector<16x64xf32>
    %cst_117 = arith.constant 4.471500e-02 : f32
    %361 = vector.broadcast %cst_117 : f32 to vector<16x64xf32>
    %362 = arith.mulf %361, %358 : vector<16x64xf32>
    %363 = arith.mulf %362, %358 : vector<16x64xf32>
    %364 = arith.mulf %363, %358 : vector<16x64xf32>
    %365 = arith.addf %358, %364 : vector<16x64xf32>
    %cst_118 = arith.constant 0.797884583 : f32
    %366 = vector.broadcast %cst_118 : f32 to vector<16x64xf32>
    %367 = arith.mulf %366, %365 : vector<16x64xf32>
    %368 = math.tanh %367 : vector<16x64xf32>
    %cst_119 = arith.constant 1.000000e+00 : f32
    %369 = vector.broadcast %cst_119 : f32 to vector<16x64xf32>
    %370 = arith.addf %369, %368 : vector<16x64xf32>
    %371 = arith.mulf %360, %370 : vector<16x64xf32>
    %372 = arith.truncf %371 : vector<16x64xf32> to vector<16x64xbf16>
    %c1_120 = arith.constant 1 : index
    %c0_121 = arith.constant 0 : index
    %c0_122 = arith.constant 0 : index
    %373 = vector.load %arg10[%c1_120, %c0_121, %c0_122] : memref<2x64x32xbf16, #tpu.memory_space<vmem>>, vector<1x64x32xbf16>
    %374 = vector.shape_cast %373 : vector<1x64x32xbf16> to vector<64x32xbf16>
    %cst_123 = arith.constant dense<0.000000e+00> : vector<16x32xf32>
    %375 = tpu.matmul %372, %374, %cst_123 {dimension_numbers = #tpu.dot_dimension_numbers<[1], [0], [0], [1], [0, 0, 1, 1], [], []>} : vector<16x64xbf16>, vector<64x32xbf16>, vector<16x32xf32> -> vector<16x32xf32>
    %376 = vector.broadcast %222 : vector<1x32xf32> to vector<16x32xf32>
    %377 = arith.addf %375, %376 : vector<16x32xf32>
    %378 = arith.addf %377, %350 : vector<16x32xf32>
    %cst_124 = arith.constant dense<0.000000e+00> : vector<16xf32>
    %379 = vector.multi_reduction <add>, %378, %cst_124 [1] : vector<16x32xf32> to vector<16xf32>
    %380 = vector.shape_cast %379 : vector<16xf32> to vector<16x1xf32>
    %cst_125 = arith.constant 3.200000e+01 : f32
    %381 = vector.broadcast %cst_125 : f32 to vector<16x1xf32>
    %382 = arith.divf %380, %381 : vector<16x1xf32>
    %383 = vector.broadcast %382 : vector<16x1xf32> to vector<16x32xf32>
    %384 = arith.subf %378, %383 : vector<16x32xf32>
    %385 = arith.mulf %384, %384 : vector<16x32xf32>
    %cst_126 = arith.constant dense<0.000000e+00> : vector<16xf32>
    %386 = vector.multi_reduction <add>, %385, %cst_126 [1] : vector<16x32xf32> to vector<16xf32>
    %387 = vector.shape_cast %386 : vector<16xf32> to vector<16x1xf32>
    %cst_127 = arith.constant 3.200000e+01 : f32
    %388 = vector.broadcast %cst_127 : f32 to vector<16x1xf32>
    %389 = arith.divf %387, %388 : vector<16x1xf32>
    %cst_128 = arith.constant 9.99999996E-13 : f32
    %390 = vector.broadcast %cst_128 : f32 to vector<16x1xf32>
    %391 = arith.addf %389, %390 : vector<16x1xf32>
    %392 = math.rsqrt %391 : vector<16x1xf32>
    %393 = vector.broadcast %392 : vector<16x1xf32> to vector<16x32xf32>
    %394 = arith.mulf %384, %393 : vector<16x32xf32>
    %395 = vector.broadcast %224 : vector<1x32xf32> to vector<16x32xf32>
    %396 = arith.mulf %394, %395 : vector<16x32xf32>
    %397 = vector.broadcast %226 : vector<1x32xf32> to vector<16x32xf32>
    %398 = arith.addf %396, %397 : vector<16x32xf32>
    %399 = arith.truncf %398 : vector<16x32xf32> to vector<16x32xbf16>
    %c0_129 = arith.constant 0 : index
    %c0_130 = arith.constant 0 : index
    %400 = vector.load %arg11[%c0_129, %c0_130] : memref<32x128xbf16, #tpu.memory_space<vmem>>, vector<32x128xbf16>
    %cst_131 = arith.constant dense<0.000000e+00> : vector<16x128xf32>
    %401 = tpu.matmul %399, %400, %cst_131 {dimension_numbers = #tpu.dot_dimension_numbers<[1], [0], [0], [1], [0, 0, 1, 1], [], []>} : vector<16x32xbf16>, vector<32x128xbf16>, vector<16x128xf32> -> vector<16x128xf32>
    %c0_132 = arith.constant 0 : index
    %c0_133 = arith.constant 0 : index
    %402 = vector.load %arg12[%c0_132, %c0_133] : memref<1x128xf32, #tpu.memory_space<vmem>>, vector<1x128xf32>
    %403 = vector.broadcast %402 : vector<1x128xf32> to vector<16x128xf32>
    %404 = arith.addf %401, %403 : vector<16x128xf32>
    %c0_134 = arith.constant 0 : index
    %c0_135 = arith.constant 0 : index
    %405 = vector.load %arg13[%c0_134, %c0_135] : memref<16x128xf32, #tpu.memory_space<vmem>>, vector<16x128xf32>
    tpu.vector_store %arg13[%c0_134, %c0_135], %404 {strides = array<i32>} : memref<16x128xf32, #tpu.memory_space<vmem>>, vector<16x128xf32>,
    return
  }
  func.func @transform_0(%arg0: i32) -> (i32, i32) {
    %c0_i32 = arith.constant 0 : i32
    %c0_i32_0 = arith.constant 0 : i32
    %c0_i32_1 = arith.constant 0 : i32
    return %c0_i32, %c0_i32_0 : i32, i32
  }
  func.func @transform_1(%arg0: i32) -> (i32, i32) {
    %c0_i32 = arith.constant 0 : i32
    %c0_i32_0 = arith.constant 0 : i32
    %c0_i32_1 = arith.constant 0 : i32
    return %c0_i32, %c0_i32_0 : i32, i32
  }
  func.func @transform_2(%arg0: i32) -> (i32, i32, i32) {
    %c0_i32 = arith.constant 0 : i32
    %c0_i32_0 = arith.constant 0 : i32
    %c0_i32_1 = arith.constant 0 : i32
    %c0_i32_2 = arith.constant 0 : i32
    return %c0_i32, %c0_i32_0, %c0_i32_1 : i32, i32, i32
  }
  func.func @transform_3(%arg0: i32) -> (i32, i32, i32) {
    %c0_i32 = arith.constant 0 : i32
    %c0_i32_0 = arith.constant 0 : i32
    %c0_i32_1 = arith.constant 0 : i32
    %c0_i32_2 = arith.constant 0 : i32
    return %c0_i32, %c0_i32_0, %c0_i32_1 : i32, i32, i32
  }
  func.func @transform_4(%arg0: i32) -> (i32, i32, i32) {
    %c0_i32 = arith.constant 0 : i32
    %c0_i32_0 = arith.constant 0 : i32
    %c0_i32_1 = arith.constant 0 : i32
    %c0_i32_2 = arith.constant 0 : i32
    return %c0_i32, %c0_i32_0, %c0_i32_1 : i32, i32, i32
  }
  func.func @transform_5(%arg0: i32) -> (i32, i32, i32) {
    %c0_i32 = arith.constant 0 : i32
    %c0_i32_0 = arith.constant 0 : i32
    %c0_i32_1 = arith.constant 0 : i32
    %c0_i32_2 = arith.constant 0 : i32
    return %c0_i32, %c0_i32_0, %c0_i32_1 : i32, i32, i32
  }
  func.func @transform_6(%arg0: i32) -> (i32, i32, i32, i32) {
    %c0_i32 = arith.constant 0 : i32
    %c0_i32_0 = arith.constant 0 : i32
    %c0_i32_1 = arith.constant 0 : i32
    %c0_i32_2 = arith.constant 0 : i32
    %c0_i32_3 = arith.constant 0 : i32
    return %c0_i32, %c0_i32_0, %c0_i32_1, %c0_i32_2 : i32, i32, i32, i32
  }
  func.func @transform_7(%arg0: i32) -> (i32, i32, i32) {
    %c0_i32 = arith.constant 0 : i32
    %c0_i32_0 = arith.constant 0 : i32
    %c0_i32_1 = arith.constant 0 : i32
    %c0_i32_2 = arith.constant 0 : i32
    return %c0_i32, %c0_i32_0, %c0_i32_1 : i32, i32, i32
  }
  func.func @transform_8(%arg0: i32) -> (i32, i32, i32) {
    %c0_i32 = arith.constant 0 : i32
    %c0_i32_0 = arith.constant 0 : i32
    %c0_i32_1 = arith.constant 0 : i32
    %c0_i32_2 = arith.constant 0 : i32
    return %c0_i32, %c0_i32_0, %c0_i32_1 : i32, i32, i32
  }
  func.func @transform_9(%arg0: i32) -> (i32, i32, i32) {
    %c0_i32 = arith.constant 0 : i32
    %c0_i32_0 = arith.constant 0 : i32
    %c0_i32_1 = arith.constant 0 : i32
    %c0_i32_2 = arith.constant 0 : i32
    return %c0_i32, %c0_i32_0, %c0_i32_1 : i32, i32, i32
  }
  func.func @transform_10(%arg0: i32) -> (i32, i32) {
    %c0_i32 = arith.constant 0 : i32
    %c0_i32_0 = arith.constant 0 : i32
    %c0_i32_1 = arith.constant 0 : i32
    return %c0_i32, %c0_i32_0 : i32, i32
  }
  func.func @transform_11(%arg0: i32) -> (i32, i32) {
    %c0_i32 = arith.constant 0 : i32
    %c0_i32_0 = arith.constant 0 : i32
    %c0_i32_1 = arith.constant 0 : i32
    return %c0_i32, %c0_i32_0 : i32, i32
  }
  func.func @transform_12(%arg0: i32) -> (i32, i32) {
    %c0_i32 = arith.constant 0 : i32
    %c0_i32_0 = arith.constant 0 : i32
    %c0_i32_1 = arith.constant 0 : i32
    return %c0_i32, %c0_i32_0 : i32, i32
  }
}

</mosaic_0001>

<bundles_post_ra>
// kernel: bert_token_cls_forward.1
= control target key start
LH: loop header
LB: loop body
LE: loop exit
PB: predicated region body
PF: predicated region fallthrough
CT: control target
= control target key end

     0   :  { %vm48_vm0 = vcmask 261120   ;;  %v2526_v15 = vmov 0.0   ;;  %vm2527_vm1 = vmmov 0   ;;  %s2529_s16 = smov 96   ;;  %s2530_s17 = smov 120   ;;  %vm170_vm2 = vcmask 64512   ;;  %s3025_s1 = inlined_call_operand.vmem [shape: f32[16,32], index: 1, kind: input, shape index: {}]   ;;  %s3026_s3 = inlined_call_operand.vmem [shape: bf16[2,32,96], index: 3, kind: input, shape index: {}]   ;;  %s3027_s2 = inlined_call_operand.vmem [shape: f32[2,1,32], index: 2, kind: input, shape index: {}]   ;;  %s3028_s4 = inlined_call_operand.vmem [shape: f32[2,1,96], index: 4, kind: input, shape index: {}]   ;;  %s3029_s0 = inlined_call_operand.vmem [shape: f32[16,16], index: 0, kind: input, shape index: {}]   ;;  %s3030_s5 = inlined_call_operand.vmem [shape: bf16[2,32,32], index: 5, kind: input, shape index: {}]   ;;  %s3031_s6 = inlined_call_operand.vmem [shape: f32[2,6,1,32], index: 6, kind: input, shape index: {}]   ;;  %s3032_s7 = inlined_call_operand.vmem [shape: bf16[2,32,64], index: 7, kind: input, shape index: {}]   ;;  %s3033_s9 = inlined_call_operand.vmem [shape: bf16[2,64,32], index: 9, kind: input, shape index: {}]   ;;  %s3034_s8 = inlined_call_operand.vmem [shape: f32[2,1,64], index: 8, kind: input, shape index: {}]   ;;  %s3035_s10 = inlined_call_operand.vmem [shape: bf16[32,128], index: 10, kind: input, shape index: {}]   ;;  %s3036_s11 = inlined_call_operand.vmem [shape: f32[1,128], index: 11, kind: input, shape index: {}]   ;;  %s3037_s12 = inlined_call_operand.vmem [shape: f32[16,128], index: 12, kind: output, shape index: {}]  }
   0x1   :  { %v46_v0 = vld [vmem:[%s3025_s1] sm:$0xff]  ;;  %v47_v1 = vld [vmem:[%s3025_s1 + $0x8] sm:$0xff]  ;;  %2190 = vmatprep.subr.bf16.mxu0 %v2526_v15  ;;  %2198 = vmatprep.subr.bf16.mxu1 %v2526_v15  ;;  %s2531_s18 = smov 112   ;;  %s2532_s19 = smov 80   ;;  %vm222_vm3 = vcmask 130048   ;;  %vm696_vm4 = vcmask 195584  }
   0x2   :  { %v49_v2 = vsel %vm48_vm0, %v46_v0, 0.0  ;;  %v52_v3 = vsel %vm48_vm0, %v47_v1, 0.0  ;;  %v2412_v14 = vld [vmem:[%s3026_s3] sm:$0xff]   ;;  %v2413_v16 = vld [vmem:[%s3026_s3 + $0x8] sm:$0xff]   ;;  %2194 = vmatprep.mubr.msk.bf16.mxu0 %vm2527_vm1, %v2526_v15  ;;  %2200 = vmatprep.mubr.msk.bf16.mxu1 %vm2527_vm1, %v2526_v15  ;;  %s2533_s20 = smov 104   ;;  %s2534_s21 = smov 72  }
   0x3   :  { %50 = vadd.xlane.f32.xlu0 %v49_v2  ;;  %2191 = vmatpush3.bf16.msra.mxu0 %v2412_v14  ;;  %v2033_v25 = vld [vmem:[%s3027_s2] ss:$0 sm:$0xff]  ;;  %v2034_v29 = vld [vmem:[%s3027_s2 + $0x1] ss:$0 sm:$0xff]  ;;  %s2528_s2 = smov 88   ;;  %v2694_v58 = vld [vmem:[%s3029_s0 + $0x8] sm:$0xff] }
   0x4   :  { %2192 = vmatprep.subr.bf16.mxu0 %v2526_v15  ;;  %v2035_v34 = vld [vmem:[%s3028_s4] ss:$0 sm:$0xff]  ;;  %s2536_s25 = smov 48   ;;  %s2537_s26 = smov 40   ;;  %vm935_vm5 = vcmask 523264  }
   0x5   :  { %v2689_v54 = vld [vmem:[%s3029_s0] sm:$0xff]  ;;  %s2535_s0 = smov 64   ;;  %s2538_s27 = smov 56  }
   0x6   :  { %s2539_s30 = smov 8   ;;  %s2540_s15 = smov 16  }
   0x7   :  { %53 = vadd.xlane.f32.xlu0 %v52_v3  ;;  %2193 = vmatpush3.bf16.msra.mxu0 %v2413_v16  ;;  %s3038_s22 = smov 24  }
   0x8   :  { %2204 = vmatprep.subr.bf16.mxu0 %v2526_v15 }
  0x90   :  { %v51_v4 = vpop.xlane.xlu0 %50 }
  0x91   :  { %v56_v5 = vmul.f32 0.03125, %v51_v4 }
  0x93   :  { %v58_v6 = vsub.f32 %v46_v0, %v56_v5 }
  0x94   :  { %v54_v7 = vpop.xlane.xlu0 %53 }
  0x95   :  { %v57_v8 = vmul.f32 0.03125, %v54_v7  ;;  %v60_v9 = vmul.f32 %v58_v6, %v58_v6 }
  0x97   :  { %v59_v10 = vsub.f32 %v47_v1, %v57_v8  ;;  %v62_v11 = vsel %vm48_vm0, %v60_v9, 0.0 }
  0x98   :  { %63 = vadd.xlane.f32.xlu1 %v62_v11 }
  0x99   :  { %v61_v12 = vmul.f32 %v59_v10, %v59_v10 }
  0x9b   :  { %v65_v13 = vsel %vm48_vm0, %v61_v12, 0.0 }
  0x9c   :  { %66 = vadd.xlane.f32.xlu1 %v65_v13 }
 0x125   :  { %v64_v17 = vpop.xlane.xlu1 %63 }
 0x126   :  { %v68_v18 = vmul.f32 0.03125, %v64_v17 }
 0x128   :  { %v70_v19 = vadd.f32 1e-12, %v68_v18 }
 0x129   :  { %v67_v20 = vpop.xlane.xlu1 %66 }
 0x12a   :  { %2434 = vrsqrt.f32 %v70_v19  ;;  %v69_v21 = vmul.f32 0.03125, %v67_v20 }
 0x12c   :  { %v71_v22 = vadd.f32 1e-12, %v69_v21 }
 0x12e   :  { %2436 = vrsqrt.f32 %v71_v22 }
 0x134   :  { %v2435_v23 = vpop.eup %2434 }
 0x135   :  { %v74_v24 = vmul.f32 %v2435_v23, %v58_v6 }
 0x137   :  { %v82_v28 = vmul.f32 %v2033_v25, %v74_v24 }
 0x138   :  { %v2437_v26 = vpop.eup %2436 }
 0x139   :  { %v75_v27 = vmul.f32 %v2437_v26, %v59_v10  ;;  %v2637_v31 = vadd.f32 %v2034_v29, %v82_v28 }
 0x13b   :  { %v83_v30 = vmul.f32 %v2033_v25, %v75_v27 }
 0x13d   :  { %v2639_v32 = vadd.f32 %v2034_v29, %v83_v30 }
 0x13f   :  { %v98_v33 = vpack.c.bf16 %v2639_v32, %v2637_v31 }
 0x141   :  { %2195 = vmatmul.mubr.msk.bf16.vlgmr.msra.gmra.mrb[0].mxu0 %vm48_vm0, %v98_v33 }
 0x142   :  { %2206 = vmatprep.mubr.msk.bf16.mxu0 %vm2527_vm1, %v2526_v15 }
 0x214   :  { %v159_v35 = vpop.f32.mrb[0].mxu0 }
 0x215   :  { %v2196_v36 = vpop.f32.mrb[1].mxu0  ;;  %v160_v38 = vadd.f32 %v2035_v34, %v159_v35 }
 0x216   :  { %v162_v37 = vpop.f32.mrb[2].mxu0 }
 0x217   :  { %v163_v39 = vadd.f32 %v2035_v34, %v162_v37  ;;  %v2197_v40 = vpop.f32.mrb[3].mxu0 }
 0x219   :  { %v2649_v41 = vpack.c.bf16 %v163_v39, %v160_v38 }
 0x21b   :  { %295 = vrot.lane.b32.xlu1 %v2649_v41, %s2528_s2  ;;  %168 = vrot.lane.b32.xlu0 %v2649_v41, %s2529_s16 }
 0x21f   :  { %293 = vrot.lane.b32.xlu1 %v2649_v41, %s2530_s17  ;;  %418 = vrot.lane.b32.xlu0 %v2649_v41, %s2531_s18 }
 0x223   :  { %420 = vrot.lane.b32.xlu1 %v2649_v41, %s2532_s19  ;;  %543 = vrot.lane.b32.xlu0 %v2649_v41, %s2533_s20 }
 0x227   :  { %545 = vrot.lane.b32.xlu1 %v2649_v41, %s2534_s21 }
 0x28d   :  { %v169_v42 = vpop.permute.xlu0 %168  ;;  %v296_v44 = vpop.permute.xlu1 %295 }
 0x28e   :  { %v175_v43 = vsel %vm170_vm2, %v169_v42, 0  ;;  %v301_v46 = vsel %vm170_vm2, %v296_v44, 0 }
 0x28f   :  { %2199 = vmatpush3.bf16.xpose.msra.mxu1 %v175_v43 }
 0x290   :  { %2210 = vmatprep.subr.bf16.mxu1 %v2526_v15 }
 0x291   :  { %v294_v45 = vpop.permute.xlu1 %293  ;;  %v419_v50 = vpop.permute.xlu0 %418 }
 0x295   :  { %v421_v47 = vpop.permute.xlu1 %420  ;;  %v544_v52 = vpop.permute.xlu0 %543 }
 0x296   :  { %2201 = vmatmul.mubr.msk.bf16.vlgmr.msra.gmra.mrb[0].mxu1 %vm170_vm2, %v2649_v41  ;;  %v426_v48 = vsel %vm170_vm2, %v421_v47, 0 }
 0x297   :  { %2211 = vmatpush3.bf16.xpose.msra.mxu1 %v301_v46  ;;  %2212 = vmatprep.mubr.msk.bf16.mxu1 %vm2527_vm1, %v2526_v15 }
 0x298   :  { %2222 = vmatprep.subr.bf16.mxu1 %v2526_v15 }
 0x299   :  { %v546_v49 = vpop.permute.xlu1 %545 }
 0x29a   :  { %v551_v51 = vsel %vm170_vm2, %v546_v49, 0 }
 0x29e   :  { %2213 = vmatmul.mubr.msk.bf16.vlgmr.msra.gmra.mrb[4].mxu1 %vm170_vm2, %v294_v45 }
 0x29f   :  { %2223 = vmatpush3.bf16.xpose.msra.mxu1 %v426_v48  ;;  %2224 = vmatprep.mubr.msk.bf16.mxu1 %vm2527_vm1, %v2526_v15 }
 0x2a0   :  { %2234 = vmatprep.subr.bf16.mxu1 %v2526_v15 }
 0x2a6   :  { %2225 = vmatmul.mubr.msk.bf16.vlgmr.msra.gmra.mrb[8].mxu1 %vm170_vm2, %v419_v50 }
 0x2a7   :  { %2235 = vmatpush3.bf16.xpose.msra.mxu1 %v551_v51  ;;  %2236 = vmatprep.mubr.msk.bf16.mxu1 %vm2527_vm1, %v2526_v15 }
 0x2a8   :  { %2246 = vmatprep.subr.bf16.mxu1 %v2526_v15 }
 0x2ae   :  { %2237 = vmatmul.mubr.msk.bf16.vlgmr.msra.gmra.mrb[12].mxu1 %vm170_vm2, %v544_v52 }
 0x2af   :  { %2250 = vmatprep.mubr.msk.bf16.mxu1 %vm2527_vm1, %v2526_v15 }
 0x369   :  { %v211_v53 = vpop.f32.mrb[0].mxu1 }
 0x36a   :  { %v218_v55 = vmul.f32 0.35355338, %v211_v53  ;;  %v2202_v56 = vpop.f32.mrb[1].mxu1 }
 0x36b   :  { %v214_v57 = vpop.f32.mrb[2].mxu1 }
 0x36c   :  { %v219_v59 = vmul.f32 0.35355338, %v214_v57  ;;  %v2203_v60 = vpop.f32.mrb[3].mxu1  ;;  %v220_v61 = vadd.f32 %v218_v55, %v2689_v54 }
 0x36e   :  { %v223_v62 = vsel %vm222_vm3, %v220_v61, -inf  ;;  %v221_v63 = vadd.f32 %v219_v59, %v2694_v58 }
 0x36f   :  { %224 = vmax.xlane.f32.xlu1 %v223_v62 }
 0x370   :  { %v226_v0 = vsel %vm222_vm3, %v221_v63, -inf }
 0x371   :  { %v337_v1 = vpop.f32.mrb[4].mxu1  ;;  %227 = vmax.xlane.f32.xlu0 %v226_v0 }
 0x372   :  { %v344_v2 = vmul.f32 0.35355338, %v337_v1  ;;  %v2214_v3 = vpop.f32.mrb[5].mxu1 }
 0x373   :  { %v340_v4 = vpop.f32.mrb[6].mxu1 }
 0x374   :  { %v345_v5 = vmul.f32 0.35355338, %v340_v4  ;;  %v2215_v6 = vpop.f32.mrb[7].mxu1  ;;  %v346_v7 = vadd.f32 %v344_v2, %v2689_v54 }
 0x376   :  { %v348_v8 = vsel %vm222_vm3, %v346_v7, -inf  ;;  %v347_v9 = vadd.f32 %v345_v5, %v2694_v58 }
 0x377   :  { %349 = vmax.xlane.f32.xlu0 %v348_v8 }
 0x378   :  { %v351_v13 = vsel %vm222_vm3, %v347_v9, -inf }
 0x379   :  { %v462_v10 = vpop.f32.mrb[8].mxu1 }
 0x37a   :  { %v469_v11 = vmul.f32 0.35355338, %v462_v10  ;;  %v2226_v12 = vpop.f32.mrb[9].mxu1 }
 0x37b   :  { %v465_v14 = vpop.f32.mrb[10].mxu1  ;;  %352 = vmax.xlane.f32.xlu0 %v351_v13 }
 0x37c   :  { %v470_v16 = vmul.f32 0.35355338, %v465_v14  ;;  %v2227_v17 = vpop.f32.mrb[11].mxu1  ;;  %v471_v18 = vadd.f32 %v469_v11, %v2689_v54 }
 0x37e   :  { %v473_v19 = vsel %vm222_vm3, %v471_v18, -inf  ;;  %v472_v20 = vadd.f32 %v470_v16, %v2694_v58 }
 0x37f   :  { %474 = vmax.xlane.f32.xlu1 %v473_v19 }
 0x380   :  { %v476_v21 = vsel %vm222_vm3, %v472_v20, -inf }
 0x381   :  { %v587_v22 = vpop.f32.mrb[12].mxu1  ;;  %477 = vmax.xlane.f32.xlu0 %v476_v21 }
 0x382   :  { %v594_v23 = vmul.f32 0.35355338, %v587_v22  ;;  %v2238_v24 = vpop.f32.mrb[13].mxu1 }
 0x383   :  { %v590_v25 = vpop.f32.mrb[14].mxu1 }
 0x384   :  { %v595_v26 = vmul.f32 0.35355338, %v590_v25  ;;  %v2239_v27 = vpop.f32.mrb[15].mxu1  ;;  %v596_v28 = vadd.f32 %v594_v23, %v2689_v54 }
 0x386   :  { %v598_v29 = vsel %vm222_vm3, %v596_v28, -inf  ;;  %v597_v30 = vadd.f32 %v595_v26, %v2694_v58 }
 0x387   :  { %599 = vmax.xlane.f32.xlu1 %v598_v29 }
 0x388   :  { %v601_v33 = vsel %vm222_vm3, %v597_v30, -inf }
 0x389   :  { %602 = vmax.xlane.f32.xlu0 %v601_v33 }
 0x398   :  { %246 = vrot.lane.b32.xlu1 %v2649_v41, %s2535_s0 }
 0x3fc   :  { %v225_v34 = vpop.xlane.xlu1 %224 }
 0x3fd   :  { %v229_v35 = vsub.f32 %v220_v61, %v225_v34 }
 0x3fe   :  { %v228_v36 = vpop.xlane.xlu0 %227 }
 0x3ff   :  { %v231_v37 = vmul.f32 1.442695, %v229_v35  ;;  %v230_v38 = vsub.f32 %v221_v63, %v228_v36 }
 0x401   :  { %2438 = vpow2.f32 %v231_v37  ;;  %v233_v39 = vmul.f32 1.442695, %v230_v38 }
 0x403   :  { %2440 = vpow2.f32 %v233_v39 }
 0x404   :  { %v350_v40 = vpop.xlane.xlu0 %349 }
 0x405   :  { %v354_v42 = vsub.f32 %v346_v7, %v350_v40 }
 0x407   :  { %v356_v43 = vmul.f32 1.442695, %v354_v42 }
 0x408   :  { %v353_v44 = vpop.xlane.xlu0 %352 }
 0x409   :  { %2442 = vpow2.f32 %v356_v43  ;;  %v355_v45 = vsub.f32 %v347_v9, %v353_v44 }
 0x40b   :  { %v2439_v46 = vpop.eup %2438  ;;  %v358_v47 = vmul.f32 1.442695, %v355_v45 }
 0x40c   :  { %v475_v48 = vpop.xlane.xlu1 %474  ;;  %v235_v49 = vsel %vm222_vm3, %v2439_v46, 0.0 }
 0x40d   :  { %v2441_v50 = vpop.eup %2440  ;;  %2444 = vpow2.f32 %v358_v47  ;;  %v479_v51 = vsub.f32 %v471_v18, %v475_v48  ;;  %236 = vadd.xlane.f32.xlu1 %v235_v49 }
 0x40e   :  { %v478_v52 = vpop.xlane.xlu0 %477  ;;  %v238_v53 = vsel %vm222_vm3, %v2441_v50, 0.0 }
 0x40f   :  { %v481_v55 = vmul.f32 1.442695, %v479_v51  ;;  %v480_v56 = vsub.f32 %v472_v20, %v478_v52  ;;  %239 = vadd.xlane.f32.xlu0 %v238_v53 }
 0x411   :  { %2446 = vpow2.f32 %v481_v55  ;;  %v483_v57 = vmul.f32 1.442695, %v480_v56 }
 0x413   :  { %v2443_v59 = vpop.eup %2442  ;;  %2448 = vpow2.f32 %v483_v57 }
 0x414   :  { %v600_v60 = vpop.xlane.xlu1 %599  ;;  %v360_v61 = vsel %vm222_vm3, %v2443_v59, 0.0 }
 0x415   :  { %v604_v62 = vsub.f32 %v596_v28, %v600_v60  ;;  %361 = vadd.xlane.f32.xlu1 %v360_v61 }
 0x416   :  { %v603_v63 = vpop.xlane.xlu0 %602 }
 0x417   :  { %v2445_v0 = vpop.eup %2444  ;;  %v606_v1 = vmul.f32 1.442695, %v604_v62  ;;  %v605_v2 = vsub.f32 %v597_v30, %v603_v63  ;;  %v2415_v62 = vld [vmem:[%s3030_s5 + $0x8] sm:$0xff]  }
 0x418   :  { %v247_v3 = vpop.permute.xlu1 %246  ;;  %v363_v4 = vsel %vm222_vm3, %v2445_v0, 0.0 }
 0x419   :  { %2450 = vpow2.f32 %v606_v1  ;;  %v608_v5 = vmul.f32 1.442695, %v605_v2  ;;  %364 = vadd.xlane.f32.xlu0 %v363_v4  ;;  %2205 = vmatpush3.bf16.msra.mxu0 %v247_v3 }
 0x41a   :  { %2216 = vmatprep.subr.bf16.mxu0 %v2526_v15 }
 0x41b   :  { %v2447_v6 = vpop.eup %2446  ;;  %2452 = vpow2.f32 %v608_v5 }
 0x41c   :  { %v485_v7 = vsel %vm222_vm3, %v2447_v6, 0.0 }
 0x41d   :  { %v2449_v8 = vpop.eup %2448  ;;  %486 = vadd.xlane.f32.xlu1 %v485_v7 }
 0x41e   :  { %v488_v9 = vsel %vm222_vm3, %v2449_v8, 0.0 }
 0x41f   :  { %489 = vadd.xlane.f32.xlu0 %v488_v9 }
 0x423   :  { %v2451_v10 = vpop.eup %2450 }
 0x424   :  { %v610_v11 = vsel %vm222_vm3, %v2451_v10, 0.0 }
 0x425   :  { %v2453_v12 = vpop.eup %2452  ;;  %611 = vadd.xlane.f32.xlu1 %v610_v11 }
 0x426   :  { %v613_v13 = vsel %vm222_vm3, %v2453_v12, 0.0 }
 0x427   :  { %614 = vadd.xlane.f32.xlu0 %v613_v13 }
 0x436   :  { %496 = vrot.lane.b32.xlu1 %v2649_v41, %s2536_s25 }
 0x43a   :  { %621 = vrot.lane.b32.xlu1 %v2649_v41, %s2537_s26 }
 0x43d   :  { %371 = vrot.lane.b32.xlu0 %v2649_v41, %s2538_s27 }
 0x49a   :  { %v237_v14 = vpop.xlane.xlu1 %236 }
 0x49b   :  { %2454 = vrcp.f32 %v237_v14 }
 0x49c   :  { %v240_v16 = vpop.xlane.xlu0 %239 }
 0x49d   :  { %2456 = vrcp.f32 %v240_v16 }
 0x4a2   :  { %v362_v22 = vpop.xlane.xlu1 %361 }
 0x4a5   :  { %v2455_v17 = vpop.eup %2454 }
 0x4a6   :  { %v365_v18 = vpop.xlane.xlu0 %364  ;;  %v243_v20 = vmul.f32 %v2455_v17, %v2439_v46 }
 0x4a7   :  { %v2457_v19 = vpop.eup %2456  ;;  %2458 = vrcp.f32 %v365_v18 }
 0x4a8   :  { %v244_v21 = vmul.f32 %v2457_v19, %v2441_v50  ;;  %2460 = vrcp.f32 %v362_v22 }
 0x4aa   :  { %v245_v23 = vpack.c.bf16 %v244_v21, %v243_v20  ;;  %v487_v41 = vpop.xlane.xlu1 %486 }
 0x4ac   :  { %2207 = vmatmul.mubr.msk.bf16.vlgmr.msra.gmra.mrb[4].mxu0 %vm222_vm3, %v245_v23  ;;  %v490_v24 = vpop.xlane.xlu0 %489 }
 0x4ad   :  { %2218 = vmatprep.mubr.msk.bf16.mxu0 %vm2527_vm1, %v2526_v15  ;;  %2462 = vrcp.f32 %v490_v24  ;;  %v2047_v24 = vld [vmem:[%s3031_s6] ss:$0 sm:$0xff] }
 0x4ae   :  { %2464 = vrcp.f32 %v487_v41 }
 0x4b1   :  { %v2459_v25 = vpop.eup %2458 }
 0x4b2   :  { %v2461_v27 = vpop.eup %2460  ;;  %v369_v28 = vmul.f32 %v2459_v25, %v2445_v0  ;;  %v612_v29 = vpop.xlane.xlu1 %611 }
 0x4b3   :  { %v368_v30 = vmul.f32 %v2461_v27, %v2443_v59  ;;  %v2414_v59 = vld [vmem:[%s3030_s5] sm:$0xff]  }
 0x4b4   :  { %v615_v26 = vpop.xlane.xlu0 %614  ;;  %2247 = vmatpush3.bf16.msra.mxu1 %v2414_v59 }
 0x4b5   :  { %2466 = vrcp.f32 %v615_v26  ;;  %v370_v34 = vpack.c.bf16 %v369_v28, %v368_v30  ;;  %2248 = vmatprep.subr.bf16.mxu1 %v2526_v15 }
 0x4b6   :  { %2468 = vrcp.f32 %v612_v29  ;;  %v497_v36 = vpop.permute.xlu1 %496 }
 0x4b7   :  { %v2463_v35 = vpop.eup %2462 }
 0x4b8   :  { %v372_v33 = vpop.permute.xlu0 %371  ;;  %v2465_v37 = vpop.eup %2464  ;;  %v494_v38 = vmul.f32 %v2463_v35, %v2449_v8  ;;  %2249 = vmatpush3.bf16.msra.mxu1 %v2415_v62 }
 0x4b9   :  { %2217 = vmatpush3.bf16.msra.mxu0 %v372_v33  ;;  %v493_v39 = vmul.f32 %v2465_v37, %v2447_v6  ;;  %2262 = vmatprep.subr.bf16.mxu1 %v2526_v15 }
 0x4ba   :  { %2228 = vmatprep.subr.bf16.mxu0 %v2526_v15  ;;  %v622_v43 = vpop.permute.xlu1 %621 }
 0x4bb   :  { %v495_v40 = vpack.c.bf16 %v494_v38, %v493_v39 }
 0x4bc   :  { %2219 = vmatmul.mubr.msk.bf16.vlgmr.msra.gmra.mrb[8].mxu0 %vm222_vm3, %v370_v34 }
 0x4bd   :  { %2229 = vmatpush3.bf16.msra.mxu0 %v497_v36  ;;  %2230 = vmatprep.mubr.msk.bf16.mxu0 %vm2527_vm1, %v2526_v15 }
 0x4be   :  { %2240 = vmatprep.subr.bf16.mxu0 %v2526_v15 }
 0x4bf   :  { %v2467_v42 = vpop.eup %2466 }
 0x4c0   :  { %v2469_v44 = vpop.eup %2468  ;;  %v619_v45 = vmul.f32 %v2467_v42, %v2453_v12 }
 0x4c1   :  { %v618_v46 = vmul.f32 %v2469_v44, %v2451_v10 }
 0x4c3   :  { %v620_v47 = vpack.c.bf16 %v619_v45, %v618_v46  ;;  %v2417_v46 = vld [vmem:[%s3032_s7 + $0x8] sm:$0xff]  }
 0x4c4   :  { %2231 = vmatmul.mubr.msk.bf16.vlgmr.msra.gmra.mrb[12].mxu0 %vm222_vm3, %v495_v40 }
 0x4c5   :  { %2241 = vmatpush3.bf16.msra.mxu0 %v622_v43  ;;  %2242 = vmatprep.mubr.msk.bf16.mxu0 %vm2527_vm1, %v2526_v15 }
 0x4c6   :  { %2254 = vmatprep.subr.bf16.mxu0 %v2526_v15 }
 0x4cc   :  { %2243 = vmatmul.mubr.msk.bf16.vlgmr.msra.gmra.mrb[16].mxu0 %vm222_vm3, %v620_v47 }
 0x4cd   :  { %2258 = vmatprep.mubr.msk.bf16.mxu0 %vm2527_vm1, %v2526_v15 }
 0x57f   :  { %v286_v48 = vpop.f32.mrb[4].mxu0 }
 0x580   :  { %v2208_v49 = vpop.f32.mrb[5].mxu0 }
 0x581   :  { %v289_v50 = vpop.f32.mrb[6].mxu0 }
 0x582   :  { %v2209_v51 = vpop.f32.mrb[7].mxu0 }
 0x58f   :  { %v411_v52 = vpop.f32.mrb[8].mxu0 }
 0x590   :  { %v2220_v53 = vpop.f32.mrb[9].mxu0 }
 0x591   :  { %v414_v55 = vpop.f32.mrb[10].mxu0 }
 0x592   :  { %v2382_v56 = vpack.i.bf16 %v414_v55, %v411_v52  ;;  %v2221_v57 = vpop.f32.mrb[11].mxu0 }
 0x594   :  { %2383 = vrot.lane.b32.xlu1 %v2382_v56, %s2539_s30  ;;  %v2051_v56 = vld [vmem:[%s3031_s6 + $0x1] ss:$0 sm:$0xff] }
 0x597   :  { %v536_v60 = vpop.f32.mrb[12].mxu0 }
 0x598   :  { %v2232_v61 = vpop.f32.mrb[13].mxu0 }
 0x599   :  { %v539_v63 = vpop.f32.mrb[14].mxu0  ;;  %v2052_v61 = vld [vmem:[%s3031_s6 + $0x2] ss:$0 sm:$0xff] }
 0x59a   :  { %v2387_v0 = vpack.i.bf16 %v539_v63, %v536_v60  ;;  %v2233_v1 = vpop.f32.mrb[15].mxu0 }
 0x59c   :  { %2388 = vrot.lane.b32.xlu0 %v2387_v0, %s2540_s15 }
 0x59f   :  { %v661_v2 = vpop.f32.mrb[16].mxu0 }
 0x5a0   :  { %v2244_v3 = vpop.f32.mrb[17].mxu0 }
 0x5a1   :  { %v664_v4 = vpop.f32.mrb[18].mxu0  ;;  %v2419_v3 = vld [vmem:[%s3033_s9 + $0x8] sm:$0xff]  }
 0x5a2   :  { %v2392_v5 = vpack.i.bf16 %v664_v4, %v661_v2  ;;  %v2245_v6 = vpop.f32.mrb[19].mxu0  ;;  %v2418_v2 = vld [vmem:[%s3033_s9] sm:$0xff]   ;;  %v2420_v4 = vld [vmem:[%s3033_s9 + $0x10] sm:$0xff]  }
 0x5a3   :  { %v2053_v6 = vld [vmem:[%s3034_s8] ss:$0 sm:$0xff] }
 0x5a4   :  { %2393 = vrot.lane.b32.xlu1 %v2392_v5, %s3038_s22  ;;  %v2421_v5 = vld [vmem:[%s3033_s9 + $0x18] sm:$0xff]  }
 0x606   :  { %v2384_v7 = vpop.permute.xlu1 %2383 }
 0x607   :  { %v2386_v9 = vunpack.i.h.bf16 %v2384_v7  ;;  %v2385_v10 = vunpack.i.l.bf16 %v2384_v7 }
 0x609   :  { %v693_v14 = vsel %vm170_vm2, %v289_v50, %v2386_v9  ;;  %v692_v16 = vsel %vm170_vm2, %v286_v48, %v2385_v10 }
 0x60e   :  { %v2389_v8 = vpop.permute.xlu0 %2388 }
 0x60f   :  { %v2391_v11 = vunpack.i.h.bf16 %v2389_v8  ;;  %v2390_v12 = vunpack.i.l.bf16 %v2389_v8 }
 0x611   :  { %v694_v19 = vsel %vm222_vm3, %v692_v16, %v2390_v12  ;;  %v695_v20 = vsel %vm222_vm3, %v693_v14, %v2391_v11 }
 0x616   :  { %v2394_v13 = vpop.permute.xlu1 %2393 }
 0x617   :  { %v2396_v17 = vunpack.i.h.bf16 %v2394_v13  ;;  %v2395_v18 = vunpack.i.l.bf16 %v2394_v13 }
 0x619   :  { %v697_v21 = vsel %vm696_vm4, %v694_v19, %v2395_v18  ;;  %v698_v22 = vsel %vm696_vm4, %v695_v20, %v2396_v17 }
 0x61a   :  { %v699_v23 = vpack.c.bf16 %v698_v22, %v697_v21 }
 0x61c   :  { %2251 = vmatmul.mubr.msk.bf16.vlgmr.msra.gmra.mrb[16].mxu1 %vm48_vm0, %v699_v23 }
 0x61d   :  { %2270 = vmatprep.mubr.msk.bf16.mxu1 %vm2527_vm1, %v2526_v15  ;;  %2263 = vmatpush3.bf16.msra.mxu1 %v2418_v2 }
 0x61e   :  { %2264 = vmatprep.subr.bf16.mxu1 %v2526_v15 }
 0x621   :  { %2265 = vmatpush3.bf16.msra.mxu1 %v2419_v3 }
 0x622   :  { %2266 = vmatprep.subr.bf16.mxu1 %v2526_v15 }
 0x625   :  { %2267 = vmatpush3.bf16.msra.mxu1 %v2420_v4 }
 0x626   :  { %2268 = vmatprep.subr.bf16.mxu1 %v2526_v15 }
 0x629   :  { %2269 = vmatpush3.bf16.msra.mxu1 %v2421_v5 }
 0x62a   :  { %2288 = vmatprep.subr.bf16.mxu1 %v2526_v15 }
 0x6ef   :  { %v759_v41 = vpop.f32.mrb[16].mxu1 }
 0x6f0   :  { %v760_v25 = vadd.f32 %v2047_v24, %v759_v41  ;;  %v2252_v26 = vpop.f32.mrb[17].mxu1 }
 0x6f1   :  { %v762_v27 = vpop.f32.mrb[18].mxu1 }
 0x6f2   :  { %v763_v28 = vadd.f32 %v2047_v24, %v762_v27  ;;  %v2253_v29 = vpop.f32.mrb[19].mxu1  ;;  %v766_v30 = vadd.f32 %v760_v25, %v2637_v31 }
 0x6f4   :  { %v768_v33 = vsel %vm48_vm0, %v766_v30, 0.0  ;;  %v767_v34 = vadd.f32 %v763_v28, %v2639_v32  ;;  %v2416_v32 = vld [vmem:[%s3032_s7] sm:$0xff]  }
 0x6f5   :  { %769 = vadd.xlane.f32.xlu0 %v768_v33  ;;  %2255 = vmatpush3.bf16.msra.mxu0 %v2416_v32 }
 0x6f6   :  { %v771_v35 = vsel %vm48_vm0, %v767_v34, 0.0  ;;  %2256 = vmatprep.subr.bf16.mxu0 %v2526_v15 }
 0x6f7   :  { %772 = vadd.xlane.f32.xlu1 %v771_v35 }
 0x6f9   :  { %2257 = vmatpush3.bf16.msra.mxu0 %v2417_v46 }
 0x6fa   :  { %2274 = vmatprep.subr.bf16.mxu0 %v2526_v15 }
 0x782   :  { %v770_v36 = vpop.xlane.xlu0 %769 }
 0x783   :  { %v774_v37 = vmul.f32 0.03125, %v770_v36 }
 0x784   :  { %v773_v38 = vpop.xlane.xlu1 %772 }
 0x785   :  { %v776_v39 = vsub.f32 %v766_v30, %v774_v37  ;;  %v775_v40 = vmul.f32 0.03125, %v773_v38 }
 0x787   :  { %v777_v42 = vsub.f32 %v767_v34, %v775_v40  ;;  %v778_v43 = vmul.f32 %v776_v39, %v776_v39  ;;  %v2057_v34 = vld [vmem:[%s3031_s6 + $0x3] ss:$0 sm:$0xff] }
 0x789   :  { %v780_v44 = vsel %vm48_vm0, %v778_v43, 0.0  ;;  %v779_v45 = vmul.f32 %v777_v42, %v777_v42 }
 0x78a   :  { %781 = vadd.xlane.f32.xlu0 %v780_v44 }
 0x78b   :  { %v783_v31 = vsel %vm48_vm0, %v779_v45, 0.0 }
 0x78e   :  { %784 = vadd.xlane.f32.xlu0 %v783_v31 }
 0x817   :  { %v782_v47 = vpop.xlane.xlu0 %781 }
 0x818   :  { %v786_v48 = vmul.f32 0.03125, %v782_v47 }
 0x81a   :  { %v788_v49 = vadd.f32 1e-12, %v786_v48 }
 0x81b   :  { %v785_v50 = vpop.xlane.xlu0 %784 }
 0x81c   :  { %2470 = vrsqrt.f32 %v788_v49  ;;  %v787_v51 = vmul.f32 0.03125, %v785_v50 }
 0x81e   :  { %v789_v52 = vadd.f32 1e-12, %v787_v51 }
 0x820   :  { %2472 = vrsqrt.f32 %v789_v52 }
 0x826   :  { %v2471_v53 = vpop.eup %2470 }
 0x827   :  { %v792_v55 = vmul.f32 %v2471_v53, %v776_v39 }
 0x829   :  { %v800_v59 = vmul.f32 %v2051_v56, %v792_v55  ;;  %v2422_v55 = vld [vmem:[%s3026_s3 + $0x10] sm:$0xff]  }
 0x82a   :  { %v2473_v57 = vpop.eup %2472 }
 0x82b   :  { %v793_v60 = vmul.f32 %v2473_v57, %v777_v42  ;;  %v808_v63 = vadd.f32 %v2052_v61, %v800_v59 }
 0x82d   :  { %v801_v62 = vmul.f32 %v2051_v56, %v793_v60  ;;  %v2423_v56 = vld [vmem:[%s3026_s3 + $0x18] sm:$0xff]  }
 0x82f   :  { %v809_v0 = vadd.f32 %v2052_v61, %v801_v62 }
 0x831   :  { %v810_v1 = vpack.c.bf16 %v809_v0, %v808_v63 }
 0x833   :  { %2259 = vmatmul.mubr.msk.bf16.vlgmr.msra.gmra.mrb[20].mxu0 %vm48_vm0, %v810_v1  ;;  %v2063_v1 = vld [vmem:[%s3031_s6 + $0x4] ss:$0 sm:$0xff] }
 0x834   :  { %2278 = vmatprep.mubr.msk.bf16.mxu0 %vm2527_vm1, %v2526_v15  ;;  %2275 = vmatpush3.bf16.msra.mxu0 %v2422_v55 }
 0x835   :  { %2276 = vmatprep.subr.bf16.mxu0 %v2526_v15 }
 0x838   :  { %2277 = vmatpush3.bf16.msra.mxu0 %v2423_v56 }
 0x839   :  { %2282 = vmatprep.subr.bf16.mxu0 %v2526_v15 }
 0x906   :  { %v871_v7 = vpop.f32.mrb[20].mxu0 }
 0x907   :  { %v872_v8 = vadd.f32 %v2053_v6, %v871_v7  ;;  %v2260_v9 = vpop.f32.mrb[21].mxu0 }
 0x908   :  { %v874_v10 = vpop.f32.mrb[22].mxu0 }
 0x909   :  { %v880_v11 = vmul.f32 0.044715, %v872_v8  ;;  %v875_v12 = vadd.f32 %v2053_v6, %v874_v10  ;;  %v2261_v13 = vpop.f32.mrb[23].mxu0  ;;  %v878_v26 = vmul.f32 0.5, %v872_v8  ;;  %v2064_v6 = vld [vmem:[%s3031_s6 + $0x5] ss:$0 sm:$0xff] }
 0x90b   :  { %v882_v14 = vmul.f32 %v880_v11, %v872_v8  ;;  %v881_v16 = vmul.f32 0.044715, %v875_v12  ;;  %v879_v27 = vmul.f32 0.5, %v875_v12  ;;  %v2076_v11 = vld [vmem:[%s3028_s4 + $0x1] ss:$0 sm:$0xff] }
 0x90d   :  { %v884_v17 = vmul.f32 %v882_v14, %v872_v8  ;;  %v883_v18 = vmul.f32 %v881_v16, %v875_v12 }
 0x90f   :  { %v886_v19 = vadd.f32 %v884_v17, %v872_v8  ;;  %v885_v20 = vmul.f32 %v883_v18, %v875_v12 }
 0x911   :  { %v888_v21 = vmul.f32 0.7978846, %v886_v19  ;;  %v887_v22 = vadd.f32 %v885_v20, %v875_v12 }
 0x913   :  { %2474 = vtanh.f32 %v888_v21  ;;  %v889_v23 = vmul.f32 0.7978846, %v887_v22 }
 0x915   :  { %2476 = vtanh.f32 %v889_v23 }
 0x91d   :  { %v2475_v24 = vpop.eup %2474 }
 0x91e   :  { %v892_v41 = vadd.f32 1.0, %v2475_v24 }
 0x91f   :  { %v2477_v25 = vpop.eup %2476 }
 0x920   :  { %v893_v28 = vadd.f32 1.0, %v2477_v25  ;;  %v894_v29 = vmul.f32 %v892_v41, %v878_v26 }
 0x922   :  { %v895_v30 = vmul.f32 %v893_v28, %v879_v27 }
 0x924   :  { %v896_v33 = vpack.c.bf16 %v895_v30, %v894_v29 }
 0x926   :  { %2271 = vmatmul.mubr.msk.bf16.vlgmr.msra.gmra.mrb[20].mxu1 %vm935_vm5, %v896_v33 }
 0x927   :  { %2290 = vmatprep.mubr.msk.bf16.mxu1 %vm2527_vm1, %v2526_v15 }
 0x9f9   :  { %v973_v35 = vpop.f32.mrb[20].mxu1 }
 0x9fa   :  { %v974_v36 = vadd.f32 %v2057_v34, %v973_v35  ;;  %v2272_v37 = vpop.f32.mrb[21].mxu1 }
 0x9fb   :  { %v976_v38 = vpop.f32.mrb[22].mxu1 }
 0x9fc   :  { %v977_v39 = vadd.f32 %v2057_v34, %v976_v38  ;;  %v2273_v40 = vpop.f32.mrb[23].mxu1  ;;  %v980_v42 = vadd.f32 %v974_v36, %v808_v63 }
 0x9fe   :  { %v982_v43 = vsel %vm48_vm0, %v980_v42, 0.0  ;;  %v981_v44 = vadd.f32 %v977_v39, %v809_v0 }
 0x9ff   :  { %983 = vadd.xlane.f32.xlu0 %v982_v43 }
 0xa00   :  { %v985_v45 = vsel %vm48_vm0, %v981_v44, 0.0 }
 0xa01   :  { %986 = vadd.xlane.f32.xlu1 %v985_v45 }
 0xa8c   :  { %v984_v31 = vpop.xlane.xlu0 %983 }
 0xa8d   :  { %v988_v32 = vmul.f32 0.03125, %v984_v31 }
 0xa8e   :  { %v987_v46 = vpop.xlane.xlu1 %986 }
 0xa8f   :  { %v990_v47 = vsub.f32 %v980_v42, %v988_v32  ;;  %v989_v48 = vmul.f32 0.03125, %v987_v46 }
 0xa91   :  { %v991_v49 = vsub.f32 %v981_v44, %v989_v48  ;;  %v992_v50 = vmul.f32 %v990_v47, %v990_v47 }
 0xa93   :  { %v994_v51 = vsel %vm48_vm0, %v992_v50, 0.0  ;;  %v993_v52 = vmul.f32 %v991_v49, %v991_v49 }
 0xa94   :  { %995 = vadd.xlane.f32.xlu0 %v994_v51 }
 0xa95   :  { %v997_v53 = vsel %vm48_vm0, %v993_v52, 0.0 }
 0xa96   :  { %998 = vadd.xlane.f32.xlu1 %v997_v53 }
 0xb21   :  { %v996_v57 = vpop.xlane.xlu0 %995 }
 0xb22   :  { %v1000_v59 = vmul.f32 0.03125, %v996_v57 }
 0xb23   :  { %v999_v60 = vpop.xlane.xlu1 %998 }
 0xb24   :  { %v1002_v61 = vadd.f32 1e-12, %v1000_v59  ;;  %v1001_v62 = vmul.f32 0.03125, %v999_v60 }
 0xb26   :  { %2478 = vrsqrt.f32 %v1002_v61  ;;  %v1003_v63 = vadd.f32 1e-12, %v1001_v62 }
 0xb28   :  { %2480 = vrsqrt.f32 %v1003_v63 }
 0xb30   :  { %v2479_v0 = vpop.eup %2478 }
 0xb31   :  { %v1006_v2 = vmul.f32 %v2479_v0, %v990_v47 }
 0xb32   :  { %v2481_v3 = vpop.eup %2480 }
 0xb33   :  { %v1014_v4 = vmul.f32 %v2063_v1, %v1006_v2  ;;  %v1007_v5 = vmul.f32 %v2481_v3, %v991_v49 }
 0xb35   :  { %v1015_v7 = vmul.f32 %v2063_v1, %v1007_v5  ;;  %v2833_v8 = vadd.f32 %v2064_v6, %v1014_v4 }
 0xb37   :  { %v2835_v9 = vadd.f32 %v2064_v6, %v1015_v7 }
 0xb39   :  { %v1031_v10 = vpack.c.bf16 %v2835_v9, %v2833_v8 }
 0xb3b   :  { %2279 = vmatmul.mubr.msk.bf16.vlgmr.msra.gmra.mrb[24].mxu0 %vm48_vm0, %v1031_v10 }
 0xb3c   :  { %2284 = vmatprep.mubr.msk.bf16.mxu0 %vm2527_vm1, %v2526_v15 }
 0xc0e   :  { %v1094_v12 = vpop.f32.mrb[24].mxu0 }
 0xc0f   :  { %v2280_v13 = vpop.f32.mrb[25].mxu0  ;;  %v1095_v16 = vadd.f32 %v2076_v11, %v1094_v12 }
 0xc10   :  { %v1097_v14 = vpop.f32.mrb[26].mxu0 }
 0xc11   :  { %v1098_v17 = vadd.f32 %v2076_v11, %v1097_v14  ;;  %v2281_v18 = vpop.f32.mrb[27].mxu0 }
 0xc13   :  { %v2845_v19 = vpack.c.bf16 %v1098_v17, %v1095_v16 }
 0xc15   :  { %1228 = vrot.lane.b32.xlu1 %v2845_v19, %s2528_s2  ;;  %1103 = vrot.lane.b32.xlu0 %v2845_v19, %s2529_s16 }
 0xc19   :  { %1226 = vrot.lane.b32.xlu1 %v2845_v19, %s2530_s17  ;;  %1351 = vrot.lane.b32.xlu0 %v2845_v19, %s2531_s18  ;;  %s3039_s18 = smov 24  }
 0xc1d   :  { %1353 = vrot.lane.b32.xlu1 %v2845_v19, %s2532_s19  ;;  %1476 = vrot.lane.b32.xlu0 %v2845_v19, %s2533_s20 }
 0xc21   :  { %1478 = vrot.lane.b32.xlu1 %v2845_v19, %s2534_s21 }
 0xc87   :  { %v1104_v20 = vpop.permute.xlu0 %1103  ;;  %v1229_v22 = vpop.permute.xlu1 %1228 }
 0xc88   :  { %v1109_v21 = vsel %vm170_vm2, %v1104_v20, 0  ;;  %v1234_v24 = vsel %vm170_vm2, %v1229_v22, 0 }
 0xc89   :  { %2283 = vmatpush3.bf16.xpose.msra.mxu0 %v1109_v21 }
 0xc8a   :  { %2294 = vmatprep.subr.bf16.mxu0 %v2526_v15 }
 0xc8b   :  { %v1227_v23 = vpop.permute.xlu1 %1226  ;;  %v1352_v27 = vpop.permute.xlu0 %1351 }
 0xc8f   :  { %v1354_v41 = vpop.permute.xlu1 %1353  ;;  %v1477_v29 = vpop.permute.xlu0 %1476 }
 0xc90   :  { %2285 = vmatmul.mubr.msk.bf16.vlgmr.msra.gmra.mrb[28].mxu0 %vm170_vm2, %v2845_v19  ;;  %v1359_v25 = vsel %vm170_vm2, %v1354_v41, 0 }
 0xc91   :  { %2295 = vmatpush3.bf16.xpose.msra.mxu0 %v1234_v24  ;;  %2296 = vmatprep.mubr.msk.bf16.mxu0 %vm2527_vm1, %v2526_v15 }
 0xc92   :  { %2306 = vmatprep.subr.bf16.mxu0 %v2526_v15 }
 0xc93   :  { %v1479_v26 = vpop.permute.xlu1 %1478 }
 0xc94   :  { %v1484_v28 = vsel %vm170_vm2, %v1479_v26, 0 }
 0xc98   :  { %2297 = vmatmul.mubr.msk.bf16.vlgmr.msra.gmra.mrb[32].mxu0 %vm170_vm2, %v1227_v23 }
 0xc99   :  { %2307 = vmatpush3.bf16.xpose.msra.mxu0 %v1359_v25  ;;  %2308 = vmatprep.mubr.msk.bf16.mxu0 %vm2527_vm1, %v2526_v15 }
 0xc9a   :  { %2318 = vmatprep.subr.bf16.mxu0 %v2526_v15 }
 0xca0   :  { %2309 = vmatmul.mubr.msk.bf16.vlgmr.msra.gmra.mrb[36].mxu0 %vm170_vm2, %v1352_v27 }
 0xca1   :  { %2319 = vmatpush3.bf16.xpose.msra.mxu0 %v1484_v28  ;;  %2320 = vmatprep.mubr.msk.bf16.mxu0 %vm2527_vm1, %v2526_v15 }
 0xca2   :  { %2330 = vmatprep.subr.bf16.mxu0 %v2526_v15 }
 0xca8   :  { %2321 = vmatmul.mubr.msk.bf16.vlgmr.msra.gmra.mrb[40].mxu0 %vm170_vm2, %v1477_v29 }
 0xca9   :  { %2334 = vmatprep.mubr.msk.bf16.mxu0 %vm2527_vm1, %v2526_v15 }
 0xd63   :  { %v1145_v30 = vpop.f32.mrb[28].mxu0 }
 0xd64   :  { %v1152_v33 = vmul.f32 0.35355338, %v1145_v30  ;;  %v2286_v34 = vpop.f32.mrb[29].mxu0 }
 0xd65   :  { %v1148_v35 = vpop.f32.mrb[30].mxu0 }
 0xd66   :  { %v1153_v36 = vmul.f32 0.35355338, %v1148_v35  ;;  %v2287_v37 = vpop.f32.mrb[31].mxu0  ;;  %v1154_v38 = vadd.f32 %v1152_v33, %v2689_v54 }
 0xd68   :  { %v1156_v39 = vsel %vm222_vm3, %v1154_v38, -inf  ;;  %v1155_v40 = vadd.f32 %v1153_v36, %v2694_v58 }
 0xd69   :  { %1157 = vmax.xlane.f32.xlu1 %v1156_v39 }
 0xd6a   :  { %v1159_v42 = vsel %vm222_vm3, %v1155_v40, -inf }
 0xd6b   :  { %1160 = vmax.xlane.f32.xlu0 %v1159_v42  ;;  %v1270_v43 = vpop.f32.mrb[32].mxu0 }
 0xd6c   :  { %v1277_v44 = vmul.f32 0.35355338, %v1270_v43  ;;  %v2298_v45 = vpop.f32.mrb[33].mxu0 }
 0xd6d   :  { %v1273_v31 = vpop.f32.mrb[34].mxu0 }
 0xd6e   :  { %v1278_v32 = vmul.f32 0.35355338, %v1273_v31  ;;  %v2299_v46 = vpop.f32.mrb[35].mxu0  ;;  %v1279_v47 = vadd.f32 %v1277_v44, %v2689_v54 }
 0xd70   :  { %v1281_v48 = vsel %vm222_vm3, %v1279_v47, -inf  ;;  %v1280_v49 = vadd.f32 %v1278_v32, %v2694_v58 }
 0xd71   :  { %1282 = vmax.xlane.f32.xlu0 %v1281_v48 }
 0xd72   :  { %v1284_v53 = vsel %vm222_vm3, %v1280_v49, -inf }
 0xd73   :  { %v1395_v50 = vpop.f32.mrb[36].mxu0 }
 0xd74   :  { %v1402_v51 = vmul.f32 0.35355338, %v1395_v50  ;;  %v2310_v52 = vpop.f32.mrb[37].mxu0 }
 0xd75   :  { %1285 = vmax.xlane.f32.xlu0 %v1284_v53  ;;  %v1398_v55 = vpop.f32.mrb[38].mxu0 }
 0xd76   :  { %v1403_v56 = vmul.f32 0.35355338, %v1398_v55  ;;  %v2311_v57 = vpop.f32.mrb[39].mxu0  ;;  %v1404_v59 = vadd.f32 %v1402_v51, %v2689_v54 }
 0xd78   :  { %v1406_v60 = vsel %vm222_vm3, %v1404_v59, -inf  ;;  %v1405_v61 = vadd.f32 %v1403_v56, %v2694_v58 }
 0xd79   :  { %1407 = vmax.xlane.f32.xlu1 %v1406_v60 }
 0xd7a   :  { %v1409_v62 = vsel %vm222_vm3, %v1405_v61, -inf }
 0xd7b   :  { %1410 = vmax.xlane.f32.xlu0 %v1409_v62  ;;  %v1520_v63 = vpop.f32.mrb[40].mxu0 }
 0xd7c   :  { %v1527_v0 = vmul.f32 0.35355338, %v1520_v63  ;;  %v2322_v1 = vpop.f32.mrb[41].mxu0 }
 0xd7d   :  { %v1523_v2 = vpop.f32.mrb[42].mxu0 }
 0xd7e   :  { %v1528_v3 = vmul.f32 0.35355338, %v1523_v2  ;;  %v2323_v4 = vpop.f32.mrb[43].mxu0  ;;  %v1529_v5 = vadd.f32 %v1527_v0, %v2689_v54 }
 0xd80   :  { %v1531_v6 = vsel %vm222_vm3, %v1529_v5, -inf  ;;  %v1530_v7 = vadd.f32 %v1528_v3, %v2694_v58 }
 0xd81   :  { %1532 = vmax.xlane.f32.xlu1 %v1531_v6 }
 0xd82   :  { %v1534_v10 = vsel %vm222_vm3, %v1530_v7, -inf }
 0xd83   :  { %1535 = vmax.xlane.f32.xlu0 %v1534_v10 }
 0xd92   :  { %1179 = vrot.lane.b32.xlu1 %v2845_v19, %s2535_s0 }
 0xdf6   :  { %v1158_v11 = vpop.xlane.xlu1 %1157 }
 0xdf7   :  { %v1162_v12 = vsub.f32 %v1154_v38, %v1158_v11 }
 0xdf8   :  { %v1161_v13 = vpop.xlane.xlu0 %1160 }
 0xdf9   :  { %v1164_v14 = vmul.f32 1.442695, %v1162_v12  ;;  %v1163_v16 = vsub.f32 %v1155_v40, %v1161_v13 }
 0xdfb   :  { %2482 = vpow2.f32 %v1164_v14  ;;  %v1166_v17 = vmul.f32 1.442695, %v1163_v16 }
 0xdfd   :  { %2484 = vpow2.f32 %v1166_v17 }
 0xdfe   :  { %v1283_v54 = vpop.xlane.xlu0 %1282 }
 0xdff   :  { %v1287_v18 = vsub.f32 %v1279_v47, %v1283_v54 }
 0xe01   :  { %v1289_v20 = vmul.f32 1.442695, %v1287_v18 }
 0xe02   :  { %v1286_v21 = vpop.xlane.xlu0 %1285 }
 0xe03   :  { %2486 = vpow2.f32 %v1289_v20  ;;  %v1288_v58 = vsub.f32 %v1280_v49, %v1286_v21 }
 0xe05   :  { %v2483_v22 = vpop.eup %2482  ;;  %v1291_v23 = vmul.f32 1.442695, %v1288_v58 }
 0xe06   :  { %v1408_v24 = vpop.xlane.xlu1 %1407  ;;  %v1168_v41 = vsel %vm222_vm3, %v2483_v22, 0.0 }
 0xe07   :  { %v2485_v25 = vpop.eup %2484  ;;  %2488 = vpow2.f32 %v1291_v23  ;;  %v1412_v26 = vsub.f32 %v1404_v59, %v1408_v24  ;;  %1169 = vadd.xlane.f32.xlu1 %v1168_v41 }
 0xe08   :  { %v1411_v27 = vpop.xlane.xlu0 %1410  ;;  %v1171_v28 = vsel %vm222_vm3, %v2485_v25, 0.0 }
 0xe09   :  { %v1414_v29 = vmul.f32 1.442695, %v1412_v26  ;;  %v1413_v30 = vsub.f32 %v1405_v61, %v1411_v27  ;;  %1172 = vadd.xlane.f32.xlu0 %v1171_v28  ;;  %v2424_v28 = vld [vmem:[%s3030_s5 + $0x10] sm:$0xff]  }
 0xe0a   :  { %2331 = vmatpush3.bf16.msra.mxu0 %v2424_v28 }
 0xe0b   :  { %2490 = vpow2.f32 %v1414_v29  ;;  %v1416_v33 = vmul.f32 1.442695, %v1413_v30  ;;  %2332 = vmatprep.subr.bf16.mxu0 %v2526_v15 }
 0xe0d   :  { %v2487_v34 = vpop.eup %2486  ;;  %2492 = vpow2.f32 %v1416_v33 }
 0xe0e   :  { %v1533_v35 = vpop.xlane.xlu1 %1532  ;;  %v1293_v36 = vsel %vm222_vm3, %v2487_v34, 0.0 }
 0xe0f   :  { %v1537_v37 = vsub.f32 %v1529_v5, %v1533_v35  ;;  %1294 = vadd.xlane.f32.xlu1 %v1293_v36  ;;  %v2425_v35 = vld [vmem:[%s3030_s5 + $0x18] sm:$0xff]  }
 0xe10   :  { %v1536_v38 = vpop.xlane.xlu0 %1535  ;;  %2333 = vmatpush3.bf16.msra.mxu0 %v2425_v35 }
 0xe11   :  { %v2489_v39 = vpop.eup %2488  ;;  %v1539_v40 = vmul.f32 1.442695, %v1537_v37  ;;  %v1538_v42 = vsub.f32 %v1530_v7, %v1536_v38  ;;  %2346 = vmatprep.subr.bf16.mxu0 %v2526_v15 }
 0xe12   :  { %v1180_v43 = vpop.permute.xlu1 %1179  ;;  %v1296_v44 = vsel %vm222_vm3, %v2489_v39, 0.0 }
 0xe13   :  { %2494 = vpow2.f32 %v1539_v40  ;;  %v1541_v45 = vmul.f32 1.442695, %v1538_v42  ;;  %2289 = vmatpush3.bf16.msra.mxu1 %v1180_v43  ;;  %1297 = vadd.xlane.f32.xlu0 %v1296_v44 }
 0xe14   :  { %2300 = vmatprep.subr.bf16.mxu1 %v2526_v15 }
 0xe15   :  { %v2491_v31 = vpop.eup %2490  ;;  %2496 = vpow2.f32 %v1541_v45 }
 0xe16   :  { %v1418_v32 = vsel %vm222_vm3, %v2491_v31, 0.0 }
 0xe17   :  { %v2493_v46 = vpop.eup %2492  ;;  %1419 = vadd.xlane.f32.xlu1 %v1418_v32 }
 0xe18   :  { %v1421_v47 = vsel %vm222_vm3, %v2493_v46, 0.0 }
 0xe19   :  { %1422 = vadd.xlane.f32.xlu0 %v1421_v47 }
 0xe1d   :  { %v2495_v48 = vpop.eup %2494 }
 0xe1e   :  { %v1543_v49 = vsel %vm222_vm3, %v2495_v48, 0.0 }
 0xe1f   :  { %v2497_v50 = vpop.eup %2496  ;;  %1544 = vadd.xlane.f32.xlu1 %v1543_v49 }
 0xe20   :  { %v1546_v51 = vsel %vm222_vm3, %v2497_v50, 0.0 }
 0xe21   :  { %1547 = vadd.xlane.f32.xlu0 %v1546_v51 }
 0xe30   :  { %1429 = vrot.lane.b32.xlu1 %v2845_v19, %s2536_s25 }
 0xe34   :  { %1554 = vrot.lane.b32.xlu1 %v2845_v19, %s2537_s26 }
 0xe37   :  { %1304 = vrot.lane.b32.xlu0 %v2845_v19, %s2538_s27 }
 0xe94   :  { %v1170_v52 = vpop.xlane.xlu1 %1169 }
 0xe95   :  { %2498 = vrcp.f32 %v1170_v52 }
 0xe96   :  { %v1173_v53 = vpop.xlane.xlu0 %1172 }
 0xe97   :  { %2500 = vrcp.f32 %v1173_v53 }
 0xe9c   :  { %v1295_v61 = vpop.xlane.xlu1 %1294 }
 0xe9f   :  { %v2499_v55 = vpop.eup %2498 }
 0xea0   :  { %v1298_v56 = vpop.xlane.xlu0 %1297  ;;  %v1176_v59 = vmul.f32 %v2499_v55, %v2483_v22 }
 0xea1   :  { %v2501_v57 = vpop.eup %2500  ;;  %2502 = vrcp.f32 %v1298_v56 }
 0xea2   :  { %v1177_v60 = vmul.f32 %v2501_v57, %v2485_v25  ;;  %2504 = vrcp.f32 %v1295_v61  ;;  %v2092_v61 = vld [vmem:[%s3031_s6 + $0x6] ss:$0 sm:$0xff] }
 0xea4   :  { %v1178_v62 = vpack.c.bf16 %v1177_v60, %v1176_v59  ;;  %v1420_v19 = vpop.xlane.xlu1 %1419 }
 0xea6   :  { %2291 = vmatmul.mubr.msk.bf16.vlgmr.msra.gmra.mrb[24].mxu1 %vm222_vm3, %v1178_v62  ;;  %v1423_v63 = vpop.xlane.xlu0 %1422 }
 0xea7   :  { %2302 = vmatprep.mubr.msk.bf16.mxu1 %vm2527_vm1, %v2526_v15  ;;  %2506 = vrcp.f32 %v1423_v63 }
 0xea8   :  { %2508 = vrcp.f32 %v1420_v19 }
 0xeab   :  { %v2503_v0 = vpop.eup %2502 }
 0xeac   :  { %v2505_v2 = vpop.eup %2504  ;;  %v1302_v3 = vmul.f32 %v2503_v0, %v2489_v39  ;;  %v1545_v4 = vpop.xlane.xlu1 %1544 }
 0xead   :  { %v1301_v5 = vmul.f32 %v2505_v2, %v2487_v34 }
 0xeae   :  { %v1548_v1 = vpop.xlane.xlu0 %1547 }
 0xeaf   :  { %2510 = vrcp.f32 %v1548_v1  ;;  %v1303_v7 = vpack.c.bf16 %v1302_v3, %v1301_v5 }
 0xeb0   :  { %2512 = vrcp.f32 %v1545_v4  ;;  %v1430_v11 = vpop.permute.xlu1 %1429 }
 0xeb1   :  { %v2507_v10 = vpop.eup %2506 }
 0xeb2   :  { %v1305_v6 = vpop.permute.xlu0 %1304  ;;  %v2509_v12 = vpop.eup %2508  ;;  %v1427_v13 = vmul.f32 %v2507_v10, %v2493_v46 }
 0xeb3   :  { %2301 = vmatpush3.bf16.msra.mxu1 %v1305_v6  ;;  %v1426_v14 = vmul.f32 %v2509_v12, %v2491_v31 }
 0xeb4   :  { %2312 = vmatprep.subr.bf16.mxu1 %v2526_v15  ;;  %v1555_v54 = vpop.permute.xlu1 %1554 }
 0xeb5   :  { %v1428_v16 = vpack.c.bf16 %v1427_v13, %v1426_v14 }
 0xeb6   :  { %2303 = vmatmul.mubr.msk.bf16.vlgmr.msra.gmra.mrb[28].mxu1 %vm222_vm3, %v1303_v7 }
 0xeb7   :  { %2313 = vmatpush3.bf16.msra.mxu1 %v1430_v11  ;;  %2314 = vmatprep.mubr.msk.bf16.mxu1 %vm2527_vm1, %v2526_v15 }
 0xeb8   :  { %2324 = vmatprep.subr.bf16.mxu1 %v2526_v15 }
 0xeb9   :  { %v2511_v17 = vpop.eup %2510 }
 0xeba   :  { %v2513_v18 = vpop.eup %2512  ;;  %v1552_v20 = vmul.f32 %v2511_v17, %v2497_v50 }
 0xebb   :  { %v1551_v21 = vmul.f32 %v2513_v18, %v2495_v48  ;;  %v2427_v18 = vld [vmem:[%s3032_s7 + $0x18] sm:$0xff]  }
 0xebd   :  { %v1553_v58 = vpack.c.bf16 %v1552_v20, %v1551_v21 }
 0xebe   :  { %2315 = vmatmul.mubr.msk.bf16.vlgmr.msra.gmra.mrb[32].mxu1 %vm222_vm3, %v1428_v16 }
 0xebf   :  { %2325 = vmatpush3.bf16.msra.mxu1 %v1555_v54  ;;  %2326 = vmatprep.mubr.msk.bf16.mxu1 %vm2527_vm1, %v2526_v15 }
 0xec0   :  { %2338 = vmatprep.subr.bf16.mxu1 %v2526_v15 }
 0xec6   :  { %2327 = vmatmul.mubr.msk.bf16.vlgmr.msra.gmra.mrb[36].mxu1 %vm222_vm3, %v1553_v58 }
 0xec7   :  { %2342 = vmatprep.mubr.msk.bf16.mxu1 %vm2527_vm1, %v2526_v15 }
 0xf79   :  { %v1219_v22 = vpop.f32.mrb[24].mxu1 }
 0xf7a   :  { %v2292_v23 = vpop.f32.mrb[25].mxu1 }
 0xf7b   :  { %v1222_v24 = vpop.f32.mrb[26].mxu1 }
 0xf7c   :  { %v2293_v41 = vpop.f32.mrb[27].mxu1 }
 0xf89   :  { %v1344_v25 = vpop.f32.mrb[28].mxu1 }
 0xf8a   :  { %v2304_v26 = vpop.f32.mrb[29].mxu1 }
 0xf8b   :  { %v1347_v27 = vpop.f32.mrb[30].mxu1  ;;  %v2096_v26 = vld [vmem:[%s3031_s6 + $0x7] ss:$0 sm:$0xff] }
 0xf8c   :  { %v2397_v29 = vpack.i.bf16 %v1347_v27, %v1344_v25  ;;  %v2305_v30 = vpop.f32.mrb[31].mxu1 }
 0xf8d   :  { %v2097_v30 = vld [vmem:[%s3031_s6 + $0x8] ss:$0 sm:$0xff] }
 0xf8e   :  { %2398 = vrot.lane.b32.xlu1 %v2397_v29, %s2539_s30 }
 0xf91   :  { %v1469_v33 = vpop.f32.mrb[32].mxu1 }
 0xf92   :  { %v2316_v34 = vpop.f32.mrb[33].mxu1 }
 0xf93   :  { %v1472_v36 = vpop.f32.mrb[34].mxu1 }
 0xf94   :  { %v2402_v37 = vpack.i.bf16 %v1472_v36, %v1469_v33  ;;  %v2317_v38 = vpop.f32.mrb[35].mxu1 }
 0xf95   :  { %v2429_v38 = vld [vmem:[%s3033_s9 + $0x28] sm:$0xff]  }
 0xf96   :  { %2403 = vrot.lane.b32.xlu0 %v2402_v37, %s2540_s15  ;;  %v2428_v37 = vld [vmem:[%s3033_s9 + $0x20] sm:$0xff]  }
 0xf99   :  { %v1594_v39 = vpop.f32.mrb[36].mxu1 }
 0xf9a   :  { %v2328_v40 = vpop.f32.mrb[37].mxu1 }
 0xf9b   :  { %v1597_v42 = vpop.f32.mrb[38].mxu1  ;;  %v2431_v40 = vld [vmem:[%s3033_s9 + $0x38] sm:$0xff]  }
 0xf9c   :  { %v2407_v43 = vpack.i.bf16 %v1597_v42, %v1594_v39  ;;  %v2329_v44 = vpop.f32.mrb[39].mxu1  ;;  %v2430_v39 = vld [vmem:[%s3033_s9 + $0x30] sm:$0xff]   ;;  %v2103_v42 = vld [vmem:[%s3034_s8 + $0x1] ss:$0 sm:$0xff] }
 0xf9e   :  { %2408 = vrot.lane.b32.xlu1 %v2407_v43, %s3039_s18 }
0x1000   :  { %v2399_v45 = vpop.permute.xlu1 %2398 }
0x1001   :  { %v2401_v32 = vunpack.i.h.bf16 %v2399_v45  ;;  %v2400_v46 = vunpack.i.l.bf16 %v2399_v45 }
0x1003   :  { %v1626_v50 = vsel %vm170_vm2, %v1222_v24, %v2401_v32  ;;  %v1625_v51 = vsel %vm170_vm2, %v1219_v22, %v2400_v46 }
0x1008   :  { %v2404_v31 = vpop.permute.xlu0 %2403 }
0x1009   :  { %v2406_v47 = vunpack.i.h.bf16 %v2404_v31  ;;  %v2405_v48 = vunpack.i.l.bf16 %v2404_v31 }
0x100b   :  { %v1628_v55 = vsel %vm222_vm3, %v1626_v50, %v2406_v47  ;;  %v1627_v56 = vsel %vm222_vm3, %v1625_v51, %v2405_v48 }
0x1010   :  { %v2409_v49 = vpop.permute.xlu1 %2408 }
0x1011   :  { %v2411_v52 = vunpack.i.h.bf16 %v2409_v49  ;;  %v2410_v53 = vunpack.i.l.bf16 %v2409_v49 }
0x1013   :  { %v1630_v57 = vsel %vm696_vm4, %v1628_v55, %v2411_v52  ;;  %v1629_v59 = vsel %vm696_vm4, %v1627_v56, %v2410_v53 }
0x1014   :  { %v1631_v60 = vpack.c.bf16 %v1630_v57, %v1629_v59 }
0x1016   :  { %2335 = vmatmul.mubr.msk.bf16.vlgmr.msra.gmra.mrb[44].mxu0 %vm48_vm0, %v1631_v60 }
0x1017   :  { %2354 = vmatprep.mubr.msk.bf16.mxu0 %vm2527_vm1, %v2526_v15  ;;  %2347 = vmatpush3.bf16.msra.mxu0 %v2428_v37 }
0x1018   :  { %2348 = vmatprep.subr.bf16.mxu0 %v2526_v15 }
0x101b   :  { %2349 = vmatpush3.bf16.msra.mxu0 %v2429_v38 }
0x101c   :  { %2350 = vmatprep.subr.bf16.mxu0 %v2526_v15 }
0x101f   :  { %2351 = vmatpush3.bf16.msra.mxu0 %v2430_v39 }
0x1020   :  { %2352 = vmatprep.subr.bf16.mxu0 %v2526_v15 }
0x1023   :  { %2353 = vmatpush3.bf16.msra.mxu0 %v2431_v40 }
0x10e9   :  { %v1692_v62 = vpop.f32.mrb[44].mxu0 }
0x10ea   :  { %v1693_v63 = vadd.f32 %v2092_v61, %v1692_v62  ;;  %v2336_v19 = vpop.f32.mrb[45].mxu0 }
0x10eb   :  { %v1695_v0 = vpop.f32.mrb[46].mxu0 }
0x10ec   :  { %v1696_v1 = vadd.f32 %v2092_v61, %v1695_v0  ;;  %v2337_v2 = vpop.f32.mrb[47].mxu0  ;;  %v1699_v3 = vadd.f32 %v1693_v63, %v2833_v8 }
0x10ee   :  { %v1701_v4 = vsel %vm48_vm0, %v1699_v3, 0.0  ;;  %v1700_v5 = vadd.f32 %v1696_v1, %v2835_v9  ;;  %v2426_v9 = vld [vmem:[%s3032_s7 + $0x10] sm:$0xff]  }
0x10ef   :  { %1702 = vadd.xlane.f32.xlu0 %v1701_v4  ;;  %2339 = vmatpush3.bf16.msra.mxu1 %v2426_v9 }
0x10f0   :  { %v1704_v6 = vsel %vm48_vm0, %v1700_v5, 0.0  ;;  %2340 = vmatprep.subr.bf16.mxu1 %v2526_v15 }
0x10f1   :  { %1705 = vadd.xlane.f32.xlu1 %v1704_v6 }
0x10f3   :  { %2341 = vmatpush3.bf16.msra.mxu1 %v2427_v18 }
0x10f4   :  { %2358 = vmatprep.subr.bf16.mxu1 %v2526_v15 }
0x117c   :  { %v1703_v7 = vpop.xlane.xlu0 %1702 }
0x117d   :  { %v1707_v10 = vmul.f32 0.03125, %v1703_v7 }
0x117e   :  { %v1706_v11 = vpop.xlane.xlu1 %1705 }
0x117f   :  { %v1709_v12 = vsub.f32 %v1699_v3, %v1707_v10  ;;  %v1708_v13 = vmul.f32 0.03125, %v1706_v11  ;;  %v2115_v3 = vld [vmem:[%s3031_s6 + $0x9] ss:$0 sm:$0xff] }
0x1181   :  { %v1710_v14 = vsub.f32 %v1700_v5, %v1708_v13  ;;  %v1711_v16 = vmul.f32 %v1709_v12, %v1709_v12 }
0x1183   :  { %v1713_v17 = vsel %vm48_vm0, %v1711_v16, 0.0  ;;  %v1712_v54 = vmul.f32 %v1710_v14, %v1710_v14 }
0x1184   :  { %1714 = vadd.xlane.f32.xlu0 %v1713_v17 }
0x1185   :  { %v1716_v8 = vsel %vm48_vm0, %v1712_v54, 0.0 }
0x1188   :  { %1717 = vadd.xlane.f32.xlu0 %v1716_v8 }
0x1211   :  { %v1715_v20 = vpop.xlane.xlu0 %1714 }
0x1212   :  { %v1719_v21 = vmul.f32 0.03125, %v1715_v20 }
0x1214   :  { %v1721_v58 = vadd.f32 1e-12, %v1719_v21 }
0x1215   :  { %v1718_v22 = vpop.xlane.xlu0 %1717 }
0x1216   :  { %2514 = vrsqrt.f32 %v1721_v58  ;;  %v1720_v23 = vmul.f32 0.03125, %v1718_v22 }
0x1218   :  { %v1722_v24 = vadd.f32 1e-12, %v1720_v23 }
0x121a   :  { %2516 = vrsqrt.f32 %v1722_v24  ;;  %v2432_v24 = vld [vmem:[%s3035_s10] sm:$0xff]  }
0x1220   :  { %v2515_v41 = vpop.eup %2514 }
0x1221   :  { %v1725_v25 = vmul.f32 %v2515_v41, %v1709_v12  ;;  %v2433_v41 = vld [vmem:[%s3035_s10 + $0x8] sm:$0xff]  }
0x1223   :  { %v1733_v28 = vmul.f32 %v2096_v26, %v1725_v25 }
0x1224   :  { %v2517_v27 = vpop.eup %2516 }
0x1225   :  { %v1726_v29 = vmul.f32 %v2517_v27, %v1710_v14  ;;  %v1741_v34 = vadd.f32 %v2097_v30, %v1733_v28 }
0x1227   :  { %v1734_v33 = vmul.f32 %v2096_v26, %v1726_v29 }
0x1229   :  { %v1742_v35 = vadd.f32 %v2097_v30, %v1734_v33 }
0x122b   :  { %v1743_v36 = vpack.c.bf16 %v1742_v35, %v1741_v34 }
0x122d   :  { %2343 = vmatmul.mubr.msk.bf16.vlgmr.msra.gmra.mrb[40].mxu1 %vm48_vm0, %v1743_v36 }
0x122e   :  { %2362 = vmatprep.mubr.msk.bf16.mxu1 %vm2527_vm1, %v2526_v15  ;;  %2359 = vmatpush3.bf16.msra.mxu1 %v2432_v24 }
0x122f   :  { %2360 = vmatprep.subr.bf16.mxu1 %v2526_v15  ;;  %v2122_v15 = vld [vmem:[%s3031_s6 + $0xb] ss:$0 sm:$0xff] }
0x1232   :  { %2361 = vmatpush3.bf16.msra.mxu1 %v2433_v41 }
0x1300   :  { %v1806_v43 = vpop.f32.mrb[40].mxu1 }
0x1301   :  { %v1807_v44 = vadd.f32 %v2103_v42, %v1806_v43  ;;  %v2344_v45 = vpop.f32.mrb[41].mxu1 }
0x1302   :  { %v1809_v31 = vpop.f32.mrb[42].mxu1 }
0x1303   :  { %v1815_v32 = vmul.f32 0.044715, %v1807_v44  ;;  %v1810_v46 = vadd.f32 %v2103_v42, %v1809_v31  ;;  %v2345_v47 = vpop.f32.mrb[43].mxu1  ;;  %v1813_v62 = vmul.f32 0.5, %v1807_v44 }
0x1305   :  { %v1817_v48 = vmul.f32 %v1815_v32, %v1807_v44  ;;  %v1816_v49 = vmul.f32 0.044715, %v1810_v46  ;;  %v1814_v63 = vmul.f32 0.5, %v1810_v46 }
0x1307   :  { %v1819_v50 = vmul.f32 %v1817_v48, %v1807_v44  ;;  %v1818_v51 = vmul.f32 %v1816_v49, %v1810_v46 }
0x1309   :  { %v1821_v52 = vadd.f32 %v1819_v50, %v1807_v44  ;;  %v1820_v53 = vmul.f32 %v1818_v51, %v1810_v46  ;;  %v2123_v44 = vld [vmem:[%s3036_s11] ss:$0 sm:$0xff] }
0x130b   :  { %v1823_v55 = vmul.f32 0.7978846, %v1821_v52  ;;  %v1822_v56 = vadd.f32 %v1820_v53, %v1810_v46 }
0x130d   :  { %2518 = vtanh.f32 %v1823_v55  ;;  %v1824_v57 = vmul.f32 0.7978846, %v1822_v56 }
0x130f   :  { %2520 = vtanh.f32 %v1824_v57 }
0x1317   :  { %v2519_v59 = vpop.eup %2518 }
0x1318   :  { %v1827_v60 = vadd.f32 1.0, %v2519_v59 }
0x1319   :  { %v2521_v61 = vpop.eup %2520 }
0x131a   :  { %v1828_v19 = vadd.f32 1.0, %v2521_v61  ;;  %v1829_v0 = vmul.f32 %v1827_v60, %v1813_v62 }
0x131c   :  { %v1830_v1 = vmul.f32 %v1828_v19, %v1814_v63 }
0x131e   :  { %v1831_v2 = vpack.c.bf16 %v1830_v1, %v1829_v0 }
0x1320   :  { %2355 = vmatmul.mubr.msk.bf16.vlgmr.msra.gmra.mrb[48].mxu0 %vm935_vm5, %v1831_v2 }
0x13f3   :  { %v1908_v4 = vpop.f32.mrb[48].mxu0 }
0x13f4   :  { %v1909_v5 = vadd.f32 %v2115_v3, %v1908_v4  ;;  %v2356_v6 = vpop.f32.mrb[49].mxu0 }
0x13f5   :  { %v1911_v7 = vpop.f32.mrb[50].mxu0 }
0x13f6   :  { %v1912_v10 = vadd.f32 %v2115_v3, %v1911_v7  ;;  %v2357_v11 = vpop.f32.mrb[51].mxu0  ;;  %v1915_v12 = vadd.f32 %v1909_v5, %v1741_v34  ;;  %v2121_v34 = vld [vmem:[%s3031_s6 + $0xa] ss:$0 sm:$0xff] }
0x13f8   :  { %v1917_v13 = vsel %vm48_vm0, %v1915_v12, 0.0  ;;  %v1916_v14 = vadd.f32 %v1912_v10, %v1742_v35 }
0x13f9   :  { %1918 = vadd.xlane.f32.xlu0 %v1917_v13 }
0x13fa   :  { %v1920_v16 = vsel %vm48_vm0, %v1916_v14, 0.0 }
0x13fb   :  { %1921 = vadd.xlane.f32.xlu1 %v1920_v16 }
0x1486   :  { %v1919_v17 = vpop.xlane.xlu0 %1918 }
0x1487   :  { %v1923_v54 = vmul.f32 0.03125, %v1919_v17 }
0x1488   :  { %v1922_v8 = vpop.xlane.xlu1 %1921 }
0x1489   :  { %v1925_v9 = vsub.f32 %v1915_v12, %v1923_v54  ;;  %v1924_v18 = vmul.f32 0.03125, %v1922_v8 }
0x148b   :  { %v1926_v20 = vsub.f32 %v1916_v14, %v1924_v18  ;;  %v1927_v21 = vmul.f32 %v1925_v9, %v1925_v9 }
0x148d   :  { %v1929_v58 = vsel %vm48_vm0, %v1927_v21, 0.0  ;;  %v1928_v22 = vmul.f32 %v1926_v20, %v1926_v20 }
0x148e   :  { %1930 = vadd.xlane.f32.xlu0 %v1929_v58 }
0x148f   :  { %v1932_v23 = vsel %vm48_vm0, %v1928_v22, 0.0 }
0x1490   :  { %1933 = vadd.xlane.f32.xlu1 %v1932_v23 }
0x151b   :  { %v1931_v25 = vpop.xlane.xlu0 %1930 }
0x151c   :  { %v1935_v26 = vmul.f32 0.03125, %v1931_v25 }
0x151d   :  { %v1934_v27 = vpop.xlane.xlu1 %1933 }
0x151e   :  { %v1937_v28 = vadd.f32 1e-12, %v1935_v26  ;;  %v1936_v29 = vmul.f32 0.03125, %v1934_v27 }
0x1520   :  { %2522 = vrsqrt.f32 %v1937_v28  ;;  %v1938_v30 = vadd.f32 1e-12, %v1936_v29 }
0x1522   :  { %2524 = vrsqrt.f32 %v1938_v30 }
0x152a   :  { %v2523_v33 = vpop.eup %2522 }
0x152b   :  { %v1941_v35 = vmul.f32 %v2523_v33, %v1925_v9 }
0x152c   :  { %v2525_v36 = vpop.eup %2524 }
0x152d   :  { %v1949_v37 = vmul.f32 %v2121_v34, %v1941_v35  ;;  %v1942_v38 = vmul.f32 %v2525_v36, %v1926_v20 }
0x152f   :  { %v1950_v39 = vmul.f32 %v2121_v34, %v1942_v38  ;;  %v1957_v40 = vadd.f32 %v2122_v15, %v1949_v37 }
0x1531   :  { %v1958_v42 = vadd.f32 %v2122_v15, %v1950_v39 }
0x1533   :  { %v1959_v43 = vpack.c.bf16 %v1958_v42, %v1957_v40 }
0x1535   :  { %2363 = vmatmul.mubr.msk.bf16.vlgmr.msra.gmra.mrb[44].mxu1 %vm48_vm0, %v1959_v43 }
0x1608   :  { %v2020_v45 = vpop.f32.mrb[44].mxu1 }
0x1609   :  { %v2021_v31 = vadd.f32 %v2123_v44, %v2020_v45  ;;  %v2364_v32 = vpop.f32.mrb[45].mxu1 }
0x160a   :  { %v2023_v46 = vpop.f32.mrb[46].mxu1 }
0x160b   :  { %2027 = vst [vmem:[%s3037_s12] sm:$0xff] %v2021_v31  ;;  %v2024_v47 = vadd.f32 %v2123_v44, %v2023_v46  ;;  %v2365_v48 = vpop.f32.mrb[47].mxu1 }
0x160d   :  { %2028 = vst [vmem:[%s3037_s12 + $0x8] sm:$0xff] %v2024_v47 }

</bundles_post_ra>
